<compile_context>
chip_gen: v6e
topology: v6e:2x2x1
jax: 0.10.0
libtpu: 0.0.40
codegen_flags: <defaults>
</compile_context>

<pallas_src>
import functools

import jax
import jax.numpy as jnp
from jax import lax
from jax.experimental import pallas as pl
from jax.experimental.pallas import tpu as pltpu

NEG_SLOPE = 0.2        # PyG GATConv default negative_slope
MASK_VALUE = -1e30     # additive mask for non-edges


def _gat_layer(x, w_ref, a_src_ref, bias_ref, mask_bias, attn_ref, *, concat, relu):
    """One dense GATConv layer; merged-head matmul, heads statically unrolled."""
    num_heads, _, fout = a_src_ref.shape
    feat_cols = num_heads * fout

    # One lane-dense matmul: all heads' features plus per-head a_dst columns.
    hf_all = jnp.dot(x, w_ref[...], preferred_element_type=jnp.float32)   # [N, H*Fout + H]

    outs = []
    acc = None
    for h in range(num_heads):
        hf = hf_all[:, h * fout:(h + 1) * fout]                           # [N, Fout]
        a_dst = hf_all[:, feat_cols + h:feat_cols + h + 1]                # [N, 1]
        # a_src directly as a row [1, N] via feature-axis contraction (no XLU transpose).
        a_src = lax.dot_general(a_src_ref[h], hf, (((1,), (1,)), ((), ())),
                                preferred_element_type=jnp.float32)       # [1, N]
        e = a_dst + a_src                                                 # [N, N]
        e = jnp.where(e > 0, e, NEG_SLOPE * e)                            # LeakyReLU(0.2)
        e = e + mask_bias                                                 # additive mask (hoisted select)
        # Softmax over source nodes j.  Every row has a self-loop, so e_max is
        # finite and masked entries underflow to exactly 0 after exp.
        e_max = jnp.max(e, axis=-1, keepdims=True)
        p = jnp.exp(e - e_max)
        denom = jnp.sum(p, axis=-1, keepdims=True)
        inv = 1.0 / denom                                                 # exact: attention maps are outputs
        attn_ref[h] = p * inv                                             # rows sum to 1 (matches PyTorch)
        # Deferred normalization: MXU matmul does not wait on the divide.
        out_h = jnp.dot(p, hf, preferred_element_type=jnp.float32) * inv  # [N, Fout]
        if concat:
            outs.append(out_h)
        else:
            acc = out_h if acc is None else acc + out_h

    if concat:
        val = jnp.concatenate(outs, axis=-1) + bias_ref[...]
    else:
        val = acc * (1.0 / num_heads) + bias_ref[...]
    if relu:
        val = jnp.maximum(val, 0.0)
    return val


def _vgat_encoder_kernel(
    # inputs
    x_ref, mask_bias_ref,
    w1_ref, as1_ref, b1_ref,
    w2_ref, as2_ref, b2_ref,
    wm_ref, asm_ref, bm_ref,
    ws_ref, ass_ref, bs_ref,
    # outputs
    z_mean_ref, z_log_std_ref, attn1_ref, attn2_ref, attn_m_ref, attn_s_ref,
    *, concat_first, concat_second,
):
    x = x_ref[...]
    mask_bias = mask_bias_ref[...]

    h1 = _gat_layer(x, w1_ref, as1_ref, b1_ref, mask_bias, attn1_ref,
                    concat=concat_first, relu=True)
    h2 = _gat_layer(h1, w2_ref, as2_ref, b2_ref, mask_bias, attn2_ref,
                    concat=concat_second, relu=True)
    # F.dropout(p=0.4, training=False) -> identity (eval mode).
    z_mean_ref[...] = _gat_layer(h2, wm_ref, asm_ref, bm_ref, mask_bias, attn_m_ref,
                                 concat=False, relu=False)
    z_log_std_ref[...] = _gat_layer(h2, ws_ref, ass_ref, bs_ref, mask_bias, attn_s_ref,
                                    concat=False, relu=False)


def _merge_weights(w, a_dst):
    """Pack [H, Fin, Fout] weights + per-head a_dst projection into [Fin, H*Fout + H]."""
    heads, fin, fout = w.shape
    w_feat = jnp.transpose(w, (1, 0, 2)).reshape(fin, heads * fout)      # concat layout
    w_adst = jnp.einsum("hif,hjf->ih", w, a_dst)                         # [Fin, H]; W_h @ att_dst_h^T
    return jnp.concatenate([w_feat, w_adst], axis=1).astype(jnp.float32)


@functools.partial(jax.jit, static_argnames=("concat_first", "concat_second"))
def vgat_encoder_forward(params, x, adj, *, concat_first, concat_second):
    (w1, a_s1, a_d1, b1), (w2, a_s2, a_d2, b2), \
        (w_m, a_sm, a_dm, b_m), (w_s, a_ss, a_ds, b_s) = params

    n = x.shape[0]
    heads1, _, _ = w1.shape
    heads2, _, _ = w2.shape
    latent = w_m.shape[2]

    # Merged per-layer weights (features + a_dst columns) -> one matmul per layer.
    wm1 = _merge_weights(w1, a_d1)
    wm2 = _merge_weights(w2, a_d2)
    wmm = _merge_weights(w_m, a_dm)
    wms = _merge_weights(w_s, a_ds)

    # Additive softmax mask, computed once (replaces per-head/per-layer selects).
    # Contract: every row of adj must have >=1 nonzero (self-loops), otherwise the
    # softmax for that row silently becomes uniform.
    # TODO(synk): pass adj as int8/bool instead of f32 for large N (4x less DMA).
    mask_bias = jnp.where(adj > 0.0, 0.0, MASK_VALUE).astype(jnp.float32)

    kernel = functools.partial(
        _vgat_encoder_kernel, concat_first=concat_first, concat_second=concat_second)

    def vmem_spec():
        return pl.BlockSpec(memory_space=pltpu.MemorySpace.VMEM)

    out_shape = (
        jax.ShapeDtypeStruct((n, latent), jnp.float32),      # z_mean
        jax.ShapeDtypeStruct((n, latent), jnp.float32),      # z_log_std
        jax.ShapeDtypeStruct((heads1, n, n), jnp.float32),   # attention, layer 1
        jax.ShapeDtypeStruct((heads2, n, n), jnp.float32),   # attention, layer 2
        jax.ShapeDtypeStruct((1, n, n), jnp.float32),        # attention, mean head
        jax.ShapeDtypeStruct((1, n, n), jnp.float32),        # attention, log_std head
    )

    # Explicit VMEM budget for the fully-resident design (matters on v7x: 64 MiB).
    param_bytes = 4 * sum(int(a.size) for a in
                          (wm1, a_s1, b1, wm2, a_s2, b2, wmm, a_sm, b_m, wms, a_ss, b_s))
    io_bytes = 4 * (int(x.size) + n * n + 2 * n * latent
                    + (heads1 + heads2 + 2) * n * n) + param_bytes
    vmem_limit = int(min(100 * 2**20, max(4 * 2**20, 2 * io_bytes + 8 * n * n * 4)))

    z_mean, z_log_std, a1, a2, am, a_std = pl.pallas_call(
        kernel,
        out_shape=out_shape,
        in_specs=[vmem_spec() for _ in range(14)],
        out_specs=tuple(vmem_spec() for _ in range(6)),
        compiler_params=pltpu.CompilerParams(vmem_limit_bytes=vmem_limit),
    )(x, mask_bias,
      wm1, a_s1, b1,
      wm2, a_s2, b2,
      wmm, a_sm, b_m,
      wms, a_ss, b_s)
    return z_mean, z_log_std, [a1, a2, am, a_std]


# ----------------------------------------------------------------------------
# Parameter construction (deterministic, glorot-uniform like PyG GATConv)
# ----------------------------------------------------------------------------
def glorot(key, shape):
    fan_in, fan_out = shape[-2], shape[-1]
    limit = (6.0 / (fan_in + fan_out)) ** 0.5
    return jax.random.uniform(key, shape, jnp.float32, -limit, limit)


def init_gat_params(key, in_dim, out_dim, heads, concat):
    k1, k2, k3 = jax.random.split(key, 3)
    w = glorot(k1, (heads, in_dim, out_dim))
    att_src = glorot(k2, (heads, 1, out_dim))
    att_dst = glorot(k3, (heads, 1, out_dim))
    bias_dim = heads * out_dim if concat else out_dim
    bias = jnp.zeros((1, bias_dim), jnp.float32)   # PyG initializes bias to zeros
    return (w, att_src, att_dst, bias)


if __name__ == "__main__":
    key = jax.random.PRNGKey(0)

    # Small, module-consistent configuration
    N = 16                      # number of graph nodes
    in_channels = 16
    hidden_dims = [8, 8]
    latent_dim = 8
    num_heads = {"first": 4, "second": 2, "mean": 1, "std": 1}
    concat_cfg = {"first": True, "second": False}

    kx, k1, k2, k3, k4 = jax.random.split(key, 5)
    x = jax.random.normal(kx, (N, in_channels), jnp.float32)

    # Deterministic bidirectional ring graph: edge_index [2, 2N]
    src = jnp.arange(N, dtype=jnp.int32)
    dst = (src + 1) % N
    edge_index = jnp.concatenate(
        [jnp.stack([src, dst]), jnp.stack([dst, src])], axis=1
    )

    # Dense adjacency mask with self-loops; adj[i, j] = 1 iff edge j -> i
    adj = jnp.zeros((N, N), jnp.float32)
    adj = adj.at[edge_index[1], edge_index[0]].set(1.0)
    adj = jnp.minimum(adj + jnp.eye(N, dtype=jnp.float32), 1.0)

    in_dim2 = hidden_dims[0] * num_heads["first"] if concat_cfg["first"] else hidden_dims[0]
    in_dim_final = (
        hidden_dims[-1] * num_heads["second"] if concat_cfg["second"] else hidden_dims[-1]
    )

    params = (
        init_gat_params(k1, in_channels, hidden_dims[0], num_heads["first"], concat_cfg["first"]),
        init_gat_params(k2, in_dim2, hidden_dims[1], num_heads["second"], concat_cfg["second"]),
        init_gat_params(k3, in_dim_final, latent_dim, num_heads["mean"], False),
        init_gat_params(k4, in_dim_final, latent_dim, num_heads["std"], False),
    )

    z_mean, z_log_std, attn = vgat_encoder_forward(
        params, x, adj,
        concat_first=concat_cfg["first"], concat_second=concat_cfg["second"])
    jax.block_until_ready((z_mean, z_log_std, attn))

    assert z_mean.shape == (N, latent_dim)
    assert z_log_std.shape == (N, latent_dim)
    assert attn[0].shape == (num_heads["first"], N, N)
    assert attn[1].shape == (num_heads["second"], N, N)
    assert attn[2].shape == (1, N, N)
    assert attn[3].shape == (1, N, N)

    # Attention rows over allowed neighbors must sum to ~1 (exact reciprocal used).
    row_sums = jnp.sum(attn[0], axis=-1)
    assert bool(jnp.all(jnp.abs(row_sums - 1.0) < 1e-4))

    print("KERNEL_OK")
</pallas_src>

<mosaic_0001>
module attributes {stable_mosaic.version = 11 : i64} {
  func.func @_vgat_encoder_kernel(%arg0: memref<16x16xf32, #tpu.memory_space<vmem>>, %arg1: memref<16x16xf32, #tpu.memory_space<vmem>>, %arg2: memref<16x36xf32, #tpu.memory_space<vmem>>, %arg3: memref<4x1x8xf32, #tpu.memory_space<vmem>>, %arg4: memref<1x32xf32, #tpu.memory_space<vmem>>, %arg5: memref<32x18xf32, #tpu.memory_space<vmem>>, %arg6: memref<2x1x8xf32, #tpu.memory_space<vmem>>, %arg7: memref<1x8xf32, #tpu.memory_space<vmem>>, %arg8: memref<8x9xf32, #tpu.memory_space<vmem>>, %arg9: memref<1x1x8xf32, #tpu.memory_space<vmem>>, %arg10: memref<1x8xf32, #tpu.memory_space<vmem>>, %arg11: memref<8x9xf32, #tpu.memory_space<vmem>>, %arg12: memref<1x1x8xf32, #tpu.memory_space<vmem>>, %arg13: memref<1x8xf32, #tpu.memory_space<vmem>>, %arg14: memref<16x8xf32, #tpu.memory_space<vmem>>, %arg15: memref<16x8xf32, #tpu.memory_space<vmem>>, %arg16: memref<4x16x16xf32, #tpu.memory_space<vmem>>, %arg17: memref<2x16x16xf32, #tpu.memory_space<vmem>>, %arg18: memref<1x16x16xf32, #tpu.memory_space<vmem>>, %arg19: memref<1x16x16xf32, #tpu.memory_space<vmem>>) attributes {dimension_semantics = [], scalar_prefetch = 0 : i64, scratch_operands = 0 : i64, tpu.core_type = #tpu.core_type<tc>} {
    %c0 = arith.constant 0 : index
    %c0_0 = arith.constant 0 : index
    %0 = vector.load %arg0[%c0, %c0_0] : memref<16x16xf32, #tpu.memory_space<vmem>>, vector<16x16xf32>
    %c0_1 = arith.constant 0 : index
    %c0_2 = arith.constant 0 : index
    %1 = vector.load %arg1[%c0_1, %c0_2] : memref<16x16xf32, #tpu.memory_space<vmem>>, vector<16x16xf32>
    %c0_3 = arith.constant 0 : index
    %c0_4 = arith.constant 0 : index
    %2 = vector.load %arg2[%c0_3, %c0_4] : memref<16x36xf32, #tpu.memory_space<vmem>>, vector<16x36xf32>
    %cst = arith.constant dense<0.000000e+00> : vector<16x36xf32>
    %3 = tpu.matmul %0, %2, %cst {dimension_numbers = #tpu.dot_dimension_numbers<[1], [0], [0], [1], [0, 0, 1, 1], [], []>} : vector<16x16xf32>, vector<16x36xf32>, vector<16x36xf32> -> vector<16x36xf32>
    %4 = vector.extract_strided_slice %3 {offsets = [0, 0], sizes = [16, 8], strides = [1, 1]} : vector<16x36xf32> to vector<16x8xf32>
    %5 = vector.extract_strided_slice %3 {offsets = [0, 32], sizes = [16, 1], strides = [1, 1]} : vector<16x36xf32> to vector<16x1xf32>
    %c0_5 = arith.constant 0 : index
    %c0_6 = arith.constant 0 : index
    %c0_7 = arith.constant 0 : index
    %6 = vector.load %arg3[%c0_5, %c0_6, %c0_7] : memref<4x1x8xf32, #tpu.memory_space<vmem>>, vector<1x1x8xf32>
    %7 = vector.shape_cast %6 : vector<1x1x8xf32> to vector<1x8xf32>
    %cst_8 = arith.constant dense<0.000000e+00> : vector<1x16xf32>
    %8 = tpu.matmul %7, %4, %cst_8 {dimension_numbers = #tpu.dot_dimension_numbers<[1], [1], [0], [0], [0, 0, 1, 0], [], []>} : vector<1x8xf32>, vector<16x8xf32>, vector<1x16xf32> -> vector<1x16xf32>
    %9 = vector.broadcast %5 : vector<16x1xf32> to vector<16x16xf32>
    %10 = vector.broadcast %8 : vector<1x16xf32> to vector<16x16xf32>
    %11 = arith.addf %9, %10 : vector<16x16xf32>
    %cst_9 = arith.constant 0.000000e+00 : f32
    %12 = vector.broadcast %cst_9 : f32 to vector<16x16xf32>
    %13 = arith.cmpf ogt, %11, %12 : vector<16x16xf32>
    %cst_10 = arith.constant 2.000000e-01 : f32
    %14 = vector.broadcast %cst_10 : f32 to vector<16x16xf32>
    %15 = arith.mulf %14, %11 : vector<16x16xf32>
    %16 = arith.select %13, %11, %15 : vector<16x16xi1>, vector<16x16xf32>
    %17 = arith.addf %16, %1 : vector<16x16xf32>
    %cst_11 = arith.constant dense<0xFF800000> : vector<16xf32>
    %18 = vector.multi_reduction <maximumf>, %17, %cst_11 [1] : vector<16x16xf32> to vector<16xf32>
    %19 = vector.shape_cast %18 : vector<16xf32> to vector<16x1xf32>
    %20 = vector.broadcast %19 : vector<16x1xf32> to vector<16x16xf32>
    %21 = arith.subf %17, %20 : vector<16x16xf32>
    %22 = math.exp %21 : vector<16x16xf32>
    %cst_12 = arith.constant dense<0.000000e+00> : vector<16xf32>
    %23 = vector.multi_reduction <add>, %22, %cst_12 [1] : vector<16x16xf32> to vector<16xf32>
    %24 = vector.shape_cast %23 : vector<16xf32> to vector<16x1xf32>
    %cst_13 = arith.constant 1.000000e+00 : f32
    %25 = vector.broadcast %cst_13 : f32 to vector<16x1xf32>
    %26 = arith.divf %25, %24 : vector<16x1xf32>
    %27 = vector.broadcast %26 : vector<16x1xf32> to vector<16x16xf32>
    %28 = arith.mulf %22, %27 : vector<16x16xf32>
    %c0_14 = arith.constant 0 : index
    %c0_15 = arith.constant 0 : index
    %c0_16 = arith.constant 0 : index
    %29 = vector.load %arg16[%c0_14, %c0_15, %c0_16] : memref<4x16x16xf32, #tpu.memory_space<vmem>>, vector<1x16x16xf32>
    %30 = vector.shape_cast %29 : vector<1x16x16xf32> to vector<16x16xf32>
    %31 = vector.shape_cast %28 : vector<16x16xf32> to vector<1x16x16xf32>
    tpu.vector_store %arg16[%c0_14, %c0_15, %c0_16], %31 {strides = array<i32>} : memref<4x16x16xf32, #tpu.memory_space<vmem>>, vector<1x16x16xf32>,
    %cst_17 = arith.constant dense<0.000000e+00> : vector<16x8xf32>
    %32 = tpu.matmul %22, %4, %cst_17 {dimension_numbers = #tpu.dot_dimension_numbers<[1], [0], [0], [1], [0, 0, 1, 1], [], []>} : vector<16x16xf32>, vector<16x8xf32>, vector<16x8xf32> -> vector<16x8xf32>
    %33 = vector.broadcast %26 : vector<16x1xf32> to vector<16x8xf32>
    %34 = arith.mulf %32, %33 : vector<16x8xf32>
    %35 = vector.extract_strided_slice %3 {offsets = [0, 8], sizes = [16, 8], strides = [1, 1]} : vector<16x36xf32> to vector<16x8xf32>
    %36 = vector.extract_strided_slice %3 {offsets = [0, 33], sizes = [16, 1], strides = [1, 1]} : vector<16x36xf32> to vector<16x1xf32>
    %c1 = arith.constant 1 : index
    %c0_18 = arith.constant 0 : index
    %c0_19 = arith.constant 0 : index
    %37 = vector.load %arg3[%c1, %c0_18, %c0_19] : memref<4x1x8xf32, #tpu.memory_space<vmem>>, vector<1x1x8xf32>
    %38 = vector.shape_cast %37 : vector<1x1x8xf32> to vector<1x8xf32>
    %cst_20 = arith.constant dense<0.000000e+00> : vector<1x16xf32>
    %39 = tpu.matmul %38, %35, %cst_20 {dimension_numbers = #tpu.dot_dimension_numbers<[1], [1], [0], [0], [0, 0, 1, 0], [], []>} : vector<1x8xf32>, vector<16x8xf32>, vector<1x16xf32> -> vector<1x16xf32>
    %40 = vector.broadcast %36 : vector<16x1xf32> to vector<16x16xf32>
    %41 = vector.broadcast %39 : vector<1x16xf32> to vector<16x16xf32>
    %42 = arith.addf %40, %41 : vector<16x16xf32>
    %cst_21 = arith.constant 0.000000e+00 : f32
    %43 = vector.broadcast %cst_21 : f32 to vector<16x16xf32>
    %44 = arith.cmpf ogt, %42, %43 : vector<16x16xf32>
    %cst_22 = arith.constant 2.000000e-01 : f32
    %45 = vector.broadcast %cst_22 : f32 to vector<16x16xf32>
    %46 = arith.mulf %45, %42 : vector<16x16xf32>
    %47 = arith.select %44, %42, %46 : vector<16x16xi1>, vector<16x16xf32>
    %48 = arith.addf %47, %1 : vector<16x16xf32>
    %cst_23 = arith.constant dense<0xFF800000> : vector<16xf32>
    %49 = vector.multi_reduction <maximumf>, %48, %cst_23 [1] : vector<16x16xf32> to vector<16xf32>
    %50 = vector.shape_cast %49 : vector<16xf32> to vector<16x1xf32>
    %51 = vector.broadcast %50 : vector<16x1xf32> to vector<16x16xf32>
    %52 = arith.subf %48, %51 : vector<16x16xf32>
    %53 = math.exp %52 : vector<16x16xf32>
    %cst_24 = arith.constant dense<0.000000e+00> : vector<16xf32>
    %54 = vector.multi_reduction <add>, %53, %cst_24 [1] : vector<16x16xf32> to vector<16xf32>
    %55 = vector.shape_cast %54 : vector<16xf32> to vector<16x1xf32>
    %cst_25 = arith.constant 1.000000e+00 : f32
    %56 = vector.broadcast %cst_25 : f32 to vector<16x1xf32>
    %57 = arith.divf %56, %55 : vector<16x1xf32>
    %58 = vector.broadcast %57 : vector<16x1xf32> to vector<16x16xf32>
    %59 = arith.mulf %53, %58 : vector<16x16xf32>
    %c1_26 = arith.constant 1 : index
    %c0_27 = arith.constant 0 : index
    %c0_28 = arith.constant 0 : index
    %60 = vector.load %arg16[%c1_26, %c0_27, %c0_28] : memref<4x16x16xf32, #tpu.memory_space<vmem>>, vector<1x16x16xf32>
    %61 = vector.shape_cast %60 : vector<1x16x16xf32> to vector<16x16xf32>
    %62 = vector.shape_cast %59 : vector<16x16xf32> to vector<1x16x16xf32>
    tpu.vector_store %arg16[%c1_26, %c0_27, %c0_28], %62 {strides = array<i32>} : memref<4x16x16xf32, #tpu.memory_space<vmem>>, vector<1x16x16xf32>,
    %cst_29 = arith.constant dense<0.000000e+00> : vector<16x8xf32>
    %63 = tpu.matmul %53, %35, %cst_29 {dimension_numbers = #tpu.dot_dimension_numbers<[1], [0], [0], [1], [0, 0, 1, 1], [], []>} : vector<16x16xf32>, vector<16x8xf32>, vector<16x8xf32> -> vector<16x8xf32>
    %64 = vector.broadcast %57 : vector<16x1xf32> to vector<16x8xf32>
    %65 = arith.mulf %63, %64 : vector<16x8xf32>
    %66 = vector.extract_strided_slice %3 {offsets = [0, 16], sizes = [16, 8], strides = [1, 1]} : vector<16x36xf32> to vector<16x8xf32>
    %67 = vector.extract_strided_slice %3 {offsets = [0, 34], sizes = [16, 1], strides = [1, 1]} : vector<16x36xf32> to vector<16x1xf32>
    %c2 = arith.constant 2 : index
    %c0_30 = arith.constant 0 : index
    %c0_31 = arith.constant 0 : index
    %68 = vector.load %arg3[%c2, %c0_30, %c0_31] : memref<4x1x8xf32, #tpu.memory_space<vmem>>, vector<1x1x8xf32>
    %69 = vector.shape_cast %68 : vector<1x1x8xf32> to vector<1x8xf32>
    %cst_32 = arith.constant dense<0.000000e+00> : vector<1x16xf32>
    %70 = tpu.matmul %69, %66, %cst_32 {dimension_numbers = #tpu.dot_dimension_numbers<[1], [1], [0], [0], [0, 0, 1, 0], [], []>} : vector<1x8xf32>, vector<16x8xf32>, vector<1x16xf32> -> vector<1x16xf32>
    %71 = vector.broadcast %67 : vector<16x1xf32> to vector<16x16xf32>
    %72 = vector.broadcast %70 : vector<1x16xf32> to vector<16x16xf32>
    %73 = arith.addf %71, %72 : vector<16x16xf32>
    %cst_33 = arith.constant 0.000000e+00 : f32
    %74 = vector.broadcast %cst_33 : f32 to vector<16x16xf32>
    %75 = arith.cmpf ogt, %73, %74 : vector<16x16xf32>
    %cst_34 = arith.constant 2.000000e-01 : f32
    %76 = vector.broadcast %cst_34 : f32 to vector<16x16xf32>
    %77 = arith.mulf %76, %73 : vector<16x16xf32>
    %78 = arith.select %75, %73, %77 : vector<16x16xi1>, vector<16x16xf32>
    %79 = arith.addf %78, %1 : vector<16x16xf32>
    %cst_35 = arith.constant dense<0xFF800000> : vector<16xf32>
    %80 = vector.multi_reduction <maximumf>, %79, %cst_35 [1] : vector<16x16xf32> to vector<16xf32>
    %81 = vector.shape_cast %80 : vector<16xf32> to vector<16x1xf32>
    %82 = vector.broadcast %81 : vector<16x1xf32> to vector<16x16xf32>
    %83 = arith.subf %79, %82 : vector<16x16xf32>
    %84 = math.exp %83 : vector<16x16xf32>
    %cst_36 = arith.constant dense<0.000000e+00> : vector<16xf32>
    %85 = vector.multi_reduction <add>, %84, %cst_36 [1] : vector<16x16xf32> to vector<16xf32>
    %86 = vector.shape_cast %85 : vector<16xf32> to vector<16x1xf32>
    %cst_37 = arith.constant 1.000000e+00 : f32
    %87 = vector.broadcast %cst_37 : f32 to vector<16x1xf32>
    %88 = arith.divf %87, %86 : vector<16x1xf32>
    %89 = vector.broadcast %88 : vector<16x1xf32> to vector<16x16xf32>
    %90 = arith.mulf %84, %89 : vector<16x16xf32>
    %c2_38 = arith.constant 2 : index
    %c0_39 = arith.constant 0 : index
    %c0_40 = arith.constant 0 : index
    %91 = vector.load %arg16[%c2_38, %c0_39, %c0_40] : memref<4x16x16xf32, #tpu.memory_space<vmem>>, vector<1x16x16xf32>
    %92 = vector.shape_cast %91 : vector<1x16x16xf32> to vector<16x16xf32>
    %93 = vector.shape_cast %90 : vector<16x16xf32> to vector<1x16x16xf32>
    tpu.vector_store %arg16[%c2_38, %c0_39, %c0_40], %93 {strides = array<i32>} : memref<4x16x16xf32, #tpu.memory_space<vmem>>, vector<1x16x16xf32>,
    %cst_41 = arith.constant dense<0.000000e+00> : vector<16x8xf32>
    %94 = tpu.matmul %84, %66, %cst_41 {dimension_numbers = #tpu.dot_dimension_numbers<[1], [0], [0], [1], [0, 0, 1, 1], [], []>} : vector<16x16xf32>, vector<16x8xf32>, vector<16x8xf32> -> vector<16x8xf32>
    %95 = vector.broadcast %88 : vector<16x1xf32> to vector<16x8xf32>
    %96 = arith.mulf %94, %95 : vector<16x8xf32>
    %97 = vector.extract_strided_slice %3 {offsets = [0, 24], sizes = [16, 8], strides = [1, 1]} : vector<16x36xf32> to vector<16x8xf32>
    %98 = vector.extract_strided_slice %3 {offsets = [0, 35], sizes = [16, 1], strides = [1, 1]} : vector<16x36xf32> to vector<16x1xf32>
    %c3 = arith.constant 3 : index
    %c0_42 = arith.constant 0 : index
    %c0_43 = arith.constant 0 : index
    %99 = vector.load %arg3[%c3, %c0_42, %c0_43] : memref<4x1x8xf32, #tpu.memory_space<vmem>>, vector<1x1x8xf32>
    %100 = vector.shape_cast %99 : vector<1x1x8xf32> to vector<1x8xf32>
    %cst_44 = arith.constant dense<0.000000e+00> : vector<1x16xf32>
    %101 = tpu.matmul %100, %97, %cst_44 {dimension_numbers = #tpu.dot_dimension_numbers<[1], [1], [0], [0], [0, 0, 1, 0], [], []>} : vector<1x8xf32>, vector<16x8xf32>, vector<1x16xf32> -> vector<1x16xf32>
    %102 = vector.broadcast %98 : vector<16x1xf32> to vector<16x16xf32>
    %103 = vector.broadcast %101 : vector<1x16xf32> to vector<16x16xf32>
    %104 = arith.addf %102, %103 : vector<16x16xf32>
    %cst_45 = arith.constant 0.000000e+00 : f32
    %105 = vector.broadcast %cst_45 : f32 to vector<16x16xf32>
    %106 = arith.cmpf ogt, %104, %105 : vector<16x16xf32>
    %cst_46 = arith.constant 2.000000e-01 : f32
    %107 = vector.broadcast %cst_46 : f32 to vector<16x16xf32>
    %108 = arith.mulf %107, %104 : vector<16x16xf32>
    %109 = arith.select %106, %104, %108 : vector<16x16xi1>, vector<16x16xf32>
    %110 = arith.addf %109, %1 : vector<16x16xf32>
    %cst_47 = arith.constant dense<0xFF800000> : vector<16xf32>
    %111 = vector.multi_reduction <maximumf>, %110, %cst_47 [1] : vector<16x16xf32> to vector<16xf32>
    %112 = vector.shape_cast %111 : vector<16xf32> to vector<16x1xf32>
    %113 = vector.broadcast %112 : vector<16x1xf32> to vector<16x16xf32>
    %114 = arith.subf %110, %113 : vector<16x16xf32>
    %115 = math.exp %114 : vector<16x16xf32>
    %cst_48 = arith.constant dense<0.000000e+00> : vector<16xf32>
    %116 = vector.multi_reduction <add>, %115, %cst_48 [1] : vector<16x16xf32> to vector<16xf32>
    %117 = vector.shape_cast %116 : vector<16xf32> to vector<16x1xf32>
    %cst_49 = arith.constant 1.000000e+00 : f32
    %118 = vector.broadcast %cst_49 : f32 to vector<16x1xf32>
    %119 = arith.divf %118, %117 : vector<16x1xf32>
    %120 = vector.broadcast %119 : vector<16x1xf32> to vector<16x16xf32>
    %121 = arith.mulf %115, %120 : vector<16x16xf32>
    %c3_50 = arith.constant 3 : index
    %c0_51 = arith.constant 0 : index
    %c0_52 = arith.constant 0 : index
    %122 = vector.load %arg16[%c3_50, %c0_51, %c0_52] : memref<4x16x16xf32, #tpu.memory_space<vmem>>, vector<1x16x16xf32>
    %123 = vector.shape_cast %122 : vector<1x16x16xf32> to vector<16x16xf32>
    %124 = vector.shape_cast %121 : vector<16x16xf32> to vector<1x16x16xf32>
    tpu.vector_store %arg16[%c3_50, %c0_51, %c0_52], %124 {strides = array<i32>} : memref<4x16x16xf32, #tpu.memory_space<vmem>>, vector<1x16x16xf32>,
    %cst_53 = arith.constant dense<0.000000e+00> : vector<16x8xf32>
    %125 = tpu.matmul %115, %97, %cst_53 {dimension_numbers = #tpu.dot_dimension_numbers<[1], [0], [0], [1], [0, 0, 1, 1], [], []>} : vector<16x16xf32>, vector<16x8xf32>, vector<16x8xf32> -> vector<16x8xf32>
    %126 = vector.broadcast %119 : vector<16x1xf32> to vector<16x8xf32>
    %127 = arith.mulf %125, %126 : vector<16x8xf32>
    %128 = tpu.concatenate %34, %65, %96, %127 in 1 : vector<16x8xf32>, vector<16x8xf32>, vector<16x8xf32>, vector<16x8xf32> -> vector<16x32xf32>
    %c0_54 = arith.constant 0 : index
    %c0_55 = arith.constant 0 : index
    %129 = vector.load %arg4[%c0_54, %c0_55] : memref<1x32xf32, #tpu.memory_space<vmem>>, vector<1x32xf32>
    %130 = vector.broadcast %129 : vector<1x32xf32> to vector<16x32xf32>
    %131 = arith.addf %128, %130 : vector<16x32xf32>
    %cst_56 = arith.constant 0.000000e+00 : f32
    %132 = vector.broadcast %cst_56 : f32 to vector<16x32xf32>
    %133 = arith.maximumf %131, %132 : vector<16x32xf32>
    %c0_57 = arith.constant 0 : index
    %c0_58 = arith.constant 0 : index
    %134 = vector.load %arg5[%c0_57, %c0_58] : memref<32x18xf32, #tpu.memory_space<vmem>>, vector<32x18xf32>
    %cst_59 = arith.constant dense<0.000000e+00> : vector<16x18xf32>
    %135 = tpu.matmul %133, %134, %cst_59 {dimension_numbers = #tpu.dot_dimension_numbers<[1], [0], [0], [1], [0, 0, 1, 1], [], []>} : vector<16x32xf32>, vector<32x18xf32>, vector<16x18xf32> -> vector<16x18xf32>
    %136 = vector.extract_strided_slice %135 {offsets = [0, 0], sizes = [16, 8], strides = [1, 1]} : vector<16x18xf32> to vector<16x8xf32>
    %137 = vector.extract_strided_slice %135 {offsets = [0, 16], sizes = [16, 1], strides = [1, 1]} : vector<16x18xf32> to vector<16x1xf32>
    %c0_60 = arith.constant 0 : index
    %c0_61 = arith.constant 0 : index
    %c0_62 = arith.constant 0 : index
    %138 = vector.load %arg6[%c0_60, %c0_61, %c0_62] : memref<2x1x8xf32, #tpu.memory_space<vmem>>, vector<1x1x8xf32>
    %139 = vector.shape_cast %138 : vector<1x1x8xf32> to vector<1x8xf32>
    %cst_63 = arith.constant dense<0.000000e+00> : vector<1x16xf32>
    %140 = tpu.matmul %139, %136, %cst_63 {dimension_numbers = #tpu.dot_dimension_numbers<[1], [1], [0], [0], [0, 0, 1, 0], [], []>} : vector<1x8xf32>, vector<16x8xf32>, vector<1x16xf32> -> vector<1x16xf32>
    %141 = vector.broadcast %137 : vector<16x1xf32> to vector<16x16xf32>
    %142 = vector.broadcast %140 : vector<1x16xf32> to vector<16x16xf32>
    %143 = arith.addf %141, %142 : vector<16x16xf32>
    %cst_64 = arith.constant 0.000000e+00 : f32
    %144 = vector.broadcast %cst_64 : f32 to vector<16x16xf32>
    %145 = arith.cmpf ogt, %143, %144 : vector<16x16xf32>
    %cst_65 = arith.constant 2.000000e-01 : f32
    %146 = vector.broadcast %cst_65 : f32 to vector<16x16xf32>
    %147 = arith.mulf %146, %143 : vector<16x16xf32>
    %148 = arith.select %145, %143, %147 : vector<16x16xi1>, vector<16x16xf32>
    %149 = arith.addf %148, %1 : vector<16x16xf32>
    %cst_66 = arith.constant dense<0xFF800000> : vector<16xf32>
    %150 = vector.multi_reduction <maximumf>, %149, %cst_66 [1] : vector<16x16xf32> to vector<16xf32>
    %151 = vector.shape_cast %150 : vector<16xf32> to vector<16x1xf32>
    %152 = vector.broadcast %151 : vector<16x1xf32> to vector<16x16xf32>
    %153 = arith.subf %149, %152 : vector<16x16xf32>
    %154 = math.exp %153 : vector<16x16xf32>
    %cst_67 = arith.constant dense<0.000000e+00> : vector<16xf32>
    %155 = vector.multi_reduction <add>, %154, %cst_67 [1] : vector<16x16xf32> to vector<16xf32>
    %156 = vector.shape_cast %155 : vector<16xf32> to vector<16x1xf32>
    %cst_68 = arith.constant 1.000000e+00 : f32
    %157 = vector.broadcast %cst_68 : f32 to vector<16x1xf32>
    %158 = arith.divf %157, %156 : vector<16x1xf32>
    %159 = vector.broadcast %158 : vector<16x1xf32> to vector<16x16xf32>
    %160 = arith.mulf %154, %159 : vector<16x16xf32>
    %c0_69 = arith.constant 0 : index
    %c0_70 = arith.constant 0 : index
    %c0_71 = arith.constant 0 : index
    %161 = vector.load %arg17[%c0_69, %c0_70, %c0_71] : memref<2x16x16xf32, #tpu.memory_space<vmem>>, vector<1x16x16xf32>
    %162 = vector.shape_cast %161 : vector<1x16x16xf32> to vector<16x16xf32>
    %163 = vector.shape_cast %160 : vector<16x16xf32> to vector<1x16x16xf32>
    tpu.vector_store %arg17[%c0_69, %c0_70, %c0_71], %163 {strides = array<i32>} : memref<2x16x16xf32, #tpu.memory_space<vmem>>, vector<1x16x16xf32>,
    %cst_72 = arith.constant dense<0.000000e+00> : vector<16x8xf32>
    %164 = tpu.matmul %154, %136, %cst_72 {dimension_numbers = #tpu.dot_dimension_numbers<[1], [0], [0], [1], [0, 0, 1, 1], [], []>} : vector<16x16xf32>, vector<16x8xf32>, vector<16x8xf32> -> vector<16x8xf32>
    %165 = vector.broadcast %158 : vector<16x1xf32> to vector<16x8xf32>
    %166 = arith.mulf %164, %165 : vector<16x8xf32>
    %167 = vector.extract_strided_slice %135 {offsets = [0, 8], sizes = [16, 8], strides = [1, 1]} : vector<16x18xf32> to vector<16x8xf32>
    %168 = vector.extract_strided_slice %135 {offsets = [0, 17], sizes = [16, 1], strides = [1, 1]} : vector<16x18xf32> to vector<16x1xf32>
    %c1_73 = arith.constant 1 : index
    %c0_74 = arith.constant 0 : index
    %c0_75 = arith.constant 0 : index
    %169 = vector.load %arg6[%c1_73, %c0_74, %c0_75] : memref<2x1x8xf32, #tpu.memory_space<vmem>>, vector<1x1x8xf32>
    %170 = vector.shape_cast %169 : vector<1x1x8xf32> to vector<1x8xf32>
    %cst_76 = arith.constant dense<0.000000e+00> : vector<1x16xf32>
    %171 = tpu.matmul %170, %167, %cst_76 {dimension_numbers = #tpu.dot_dimension_numbers<[1], [1], [0], [0], [0, 0, 1, 0], [], []>} : vector<1x8xf32>, vector<16x8xf32>, vector<1x16xf32> -> vector<1x16xf32>
    %172 = vector.broadcast %168 : vector<16x1xf32> to vector<16x16xf32>
    %173 = vector.broadcast %171 : vector<1x16xf32> to vector<16x16xf32>
    %174 = arith.addf %172, %173 : vector<16x16xf32>
    %cst_77 = arith.constant 0.000000e+00 : f32
    %175 = vector.broadcast %cst_77 : f32 to vector<16x16xf32>
    %176 = arith.cmpf ogt, %174, %175 : vector<16x16xf32>
    %cst_78 = arith.constant 2.000000e-01 : f32
    %177 = vector.broadcast %cst_78 : f32 to vector<16x16xf32>
    %178 = arith.mulf %177, %174 : vector<16x16xf32>
    %179 = arith.select %176, %174, %178 : vector<16x16xi1>, vector<16x16xf32>
    %180 = arith.addf %179, %1 : vector<16x16xf32>
    %cst_79 = arith.constant dense<0xFF800000> : vector<16xf32>
    %181 = vector.multi_reduction <maximumf>, %180, %cst_79 [1] : vector<16x16xf32> to vector<16xf32>
    %182 = vector.shape_cast %181 : vector<16xf32> to vector<16x1xf32>
    %183 = vector.broadcast %182 : vector<16x1xf32> to vector<16x16xf32>
    %184 = arith.subf %180, %183 : vector<16x16xf32>
    %185 = math.exp %184 : vector<16x16xf32>
    %cst_80 = arith.constant dense<0.000000e+00> : vector<16xf32>
    %186 = vector.multi_reduction <add>, %185, %cst_80 [1] : vector<16x16xf32> to vector<16xf32>
    %187 = vector.shape_cast %186 : vector<16xf32> to vector<16x1xf32>
    %cst_81 = arith.constant 1.000000e+00 : f32
    %188 = vector.broadcast %cst_81 : f32 to vector<16x1xf32>
    %189 = arith.divf %188, %187 : vector<16x1xf32>
    %190 = vector.broadcast %189 : vector<16x1xf32> to vector<16x16xf32>
    %191 = arith.mulf %185, %190 : vector<16x16xf32>
    %c1_82 = arith.constant 1 : index
    %c0_83 = arith.constant 0 : index
    %c0_84 = arith.constant 0 : index
    %192 = vector.load %arg17[%c1_82, %c0_83, %c0_84] : memref<2x16x16xf32, #tpu.memory_space<vmem>>, vector<1x16x16xf32>
    %193 = vector.shape_cast %192 : vector<1x16x16xf32> to vector<16x16xf32>
    %194 = vector.shape_cast %191 : vector<16x16xf32> to vector<1x16x16xf32>
    tpu.vector_store %arg17[%c1_82, %c0_83, %c0_84], %194 {strides = array<i32>} : memref<2x16x16xf32, #tpu.memory_space<vmem>>, vector<1x16x16xf32>,
    %cst_85 = arith.constant dense<0.000000e+00> : vector<16x8xf32>
    %195 = tpu.matmul %185, %167, %cst_85 {dimension_numbers = #tpu.dot_dimension_numbers<[1], [0], [0], [1], [0, 0, 1, 1], [], []>} : vector<16x16xf32>, vector<16x8xf32>, vector<16x8xf32> -> vector<16x8xf32>
    %196 = vector.broadcast %189 : vector<16x1xf32> to vector<16x8xf32>
    %197 = arith.mulf %195, %196 : vector<16x8xf32>
    %198 = arith.addf %166, %197 : vector<16x8xf32>
    %cst_86 = arith.constant 5.000000e-01 : f32
    %199 = vector.broadcast %cst_86 : f32 to vector<16x8xf32>
    %200 = arith.mulf %198, %199 : vector<16x8xf32>
    %c0_87 = arith.constant 0 : index
    %c0_88 = arith.constant 0 : index
    %201 = vector.load %arg7[%c0_87, %c0_88] : memref<1x8xf32, #tpu.memory_space<vmem>>, vector<1x8xf32>
    %202 = vector.broadcast %201 : vector<1x8xf32> to vector<16x8xf32>
    %203 = arith.addf %200, %202 : vector<16x8xf32>
    %cst_89 = arith.constant 0.000000e+00 : f32
    %204 = vector.broadcast %cst_89 : f32 to vector<16x8xf32>
    %205 = arith.maximumf %203, %204 : vector<16x8xf32>
    %c0_90 = arith.constant 0 : index
    %c0_91 = arith.constant 0 : index
    %206 = vector.load %arg8[%c0_90, %c0_91] : memref<8x9xf32, #tpu.memory_space<vmem>>, vector<8x9xf32>
    %cst_92 = arith.constant dense<0.000000e+00> : vector<16x9xf32>
    %207 = tpu.matmul %205, %206, %cst_92 {dimension_numbers = #tpu.dot_dimension_numbers<[1], [0], [0], [1], [0, 0, 1, 1], [], []>} : vector<16x8xf32>, vector<8x9xf32>, vector<16x9xf32> -> vector<16x9xf32>
    %208 = vector.extract_strided_slice %207 {offsets = [0, 0], sizes = [16, 8], strides = [1, 1]} : vector<16x9xf32> to vector<16x8xf32>
    %209 = vector.extract_strided_slice %207 {offsets = [0, 8], sizes = [16, 1], strides = [1, 1]} : vector<16x9xf32> to vector<16x1xf32>
    %c0_93 = arith.constant 0 : index
    %c0_94 = arith.constant 0 : index
    %c0_95 = arith.constant 0 : index
    %210 = vector.load %arg9[%c0_93, %c0_94, %c0_95] : memref<1x1x8xf32, #tpu.memory_space<vmem>>, vector<1x1x8xf32>
    %211 = vector.shape_cast %210 : vector<1x1x8xf32> to vector<1x8xf32>
    %cst_96 = arith.constant dense<0.000000e+00> : vector<1x16xf32>
    %212 = tpu.matmul %211, %208, %cst_96 {dimension_numbers = #tpu.dot_dimension_numbers<[1], [1], [0], [0], [0, 0, 1, 0], [], []>} : vector<1x8xf32>, vector<16x8xf32>, vector<1x16xf32> -> vector<1x16xf32>
    %213 = vector.broadcast %209 : vector<16x1xf32> to vector<16x16xf32>
    %214 = vector.broadcast %212 : vector<1x16xf32> to vector<16x16xf32>
    %215 = arith.addf %213, %214 : vector<16x16xf32>
    %cst_97 = arith.constant 0.000000e+00 : f32
    %216 = vector.broadcast %cst_97 : f32 to vector<16x16xf32>
    %217 = arith.cmpf ogt, %215, %216 : vector<16x16xf32>
    %cst_98 = arith.constant 2.000000e-01 : f32
    %218 = vector.broadcast %cst_98 : f32 to vector<16x16xf32>
    %219 = arith.mulf %218, %215 : vector<16x16xf32>
    %220 = arith.select %217, %215, %219 : vector<16x16xi1>, vector<16x16xf32>
    %221 = arith.addf %220, %1 : vector<16x16xf32>
    %cst_99 = arith.constant dense<0xFF800000> : vector<16xf32>
    %222 = vector.multi_reduction <maximumf>, %221, %cst_99 [1] : vector<16x16xf32> to vector<16xf32>
    %223 = vector.shape_cast %222 : vector<16xf32> to vector<16x1xf32>
    %224 = vector.broadcast %223 : vector<16x1xf32> to vector<16x16xf32>
    %225 = arith.subf %221, %224 : vector<16x16xf32>
    %226 = math.exp %225 : vector<16x16xf32>
    %cst_100 = arith.constant dense<0.000000e+00> : vector<16xf32>
    %227 = vector.multi_reduction <add>, %226, %cst_100 [1] : vector<16x16xf32> to vector<16xf32>
    %228 = vector.shape_cast %227 : vector<16xf32> to vector<16x1xf32>
    %cst_101 = arith.constant 1.000000e+00 : f32
    %229 = vector.broadcast %cst_101 : f32 to vector<16x1xf32>
    %230 = arith.divf %229, %228 : vector<16x1xf32>
    %231 = vector.broadcast %230 : vector<16x1xf32> to vector<16x16xf32>
    %232 = arith.mulf %226, %231 : vector<16x16xf32>
    %c0_102 = arith.constant 0 : index
    %c0_103 = arith.constant 0 : index
    %c0_104 = arith.constant 0 : index
    %233 = vector.load %arg18[%c0_102, %c0_103, %c0_104] : memref<1x16x16xf32, #tpu.memory_space<vmem>>, vector<1x16x16xf32>
    %234 = vector.shape_cast %233 : vector<1x16x16xf32> to vector<16x16xf32>
    %235 = vector.shape_cast %232 : vector<16x16xf32> to vector<1x16x16xf32>
    tpu.vector_store %arg18[%c0_102, %c0_103, %c0_104], %235 {strides = array<i32>} : memref<1x16x16xf32, #tpu.memory_space<vmem>>, vector<1x16x16xf32>,
    %cst_105 = arith.constant dense<0.000000e+00> : vector<16x8xf32>
    %236 = tpu.matmul %226, %208, %cst_105 {dimension_numbers = #tpu.dot_dimension_numbers<[1], [0], [0], [1], [0, 0, 1, 1], [], []>} : vector<16x16xf32>, vector<16x8xf32>, vector<16x8xf32> -> vector<16x8xf32>
    %237 = vector.broadcast %230 : vector<16x1xf32> to vector<16x8xf32>
    %238 = arith.mulf %236, %237 : vector<16x8xf32>
    %cst_106 = arith.constant 1.000000e+00 : f32
    %239 = vector.broadcast %cst_106 : f32 to vector<16x8xf32>
    %240 = arith.mulf %238, %239 : vector<16x8xf32>
    %c0_107 = arith.constant 0 : index
    %c0_108 = arith.constant 0 : index
    %241 = vector.load %arg10[%c0_107, %c0_108] : memref<1x8xf32, #tpu.memory_space<vmem>>, vector<1x8xf32>
    %242 = vector.broadcast %241 : vector<1x8xf32> to vector<16x8xf32>
    %243 = arith.addf %240, %242 : vector<16x8xf32>
    %c0_109 = arith.constant 0 : index
    %c0_110 = arith.constant 0 : index
    %244 = vector.load %arg14[%c0_109, %c0_110] : memref<16x8xf32, #tpu.memory_space<vmem>>, vector<16x8xf32>
    tpu.vector_store %arg14[%c0_109, %c0_110], %243 {strides = array<i32>} : memref<16x8xf32, #tpu.memory_space<vmem>>, vector<16x8xf32>,
    %c0_111 = arith.constant 0 : index
    %c0_112 = arith.constant 0 : index
    %245 = vector.load %arg11[%c0_111, %c0_112] : memref<8x9xf32, #tpu.memory_space<vmem>>, vector<8x9xf32>
    %cst_113 = arith.constant dense<0.000000e+00> : vector<16x9xf32>
    %246 = tpu.matmul %205, %245, %cst_113 {dimension_numbers = #tpu.dot_dimension_numbers<[1], [0], [0], [1], [0, 0, 1, 1], [], []>} : vector<16x8xf32>, vector<8x9xf32>, vector<16x9xf32> -> vector<16x9xf32>
    %247 = vector.extract_strided_slice %246 {offsets = [0, 0], sizes = [16, 8], strides = [1, 1]} : vector<16x9xf32> to vector<16x8xf32>
    %248 = vector.extract_strided_slice %246 {offsets = [0, 8], sizes = [16, 1], strides = [1, 1]} : vector<16x9xf32> to vector<16x1xf32>
    %c0_114 = arith.constant 0 : index
    %c0_115 = arith.constant 0 : index
    %c0_116 = arith.constant 0 : index
    %249 = vector.load %arg12[%c0_114, %c0_115, %c0_116] : memref<1x1x8xf32, #tpu.memory_space<vmem>>, vector<1x1x8xf32>
    %250 = vector.shape_cast %249 : vector<1x1x8xf32> to vector<1x8xf32>
    %cst_117 = arith.constant dense<0.000000e+00> : vector<1x16xf32>
    %251 = tpu.matmul %250, %247, %cst_117 {dimension_numbers = #tpu.dot_dimension_numbers<[1], [1], [0], [0], [0, 0, 1, 0], [], []>} : vector<1x8xf32>, vector<16x8xf32>, vector<1x16xf32> -> vector<1x16xf32>
    %252 = vector.broadcast %248 : vector<16x1xf32> to vector<16x16xf32>
    %253 = vector.broadcast %251 : vector<1x16xf32> to vector<16x16xf32>
    %254 = arith.addf %252, %253 : vector<16x16xf32>
    %cst_118 = arith.constant 0.000000e+00 : f32
    %255 = vector.broadcast %cst_118 : f32 to vector<16x16xf32>
    %256 = arith.cmpf ogt, %254, %255 : vector<16x16xf32>
    %cst_119 = arith.constant 2.000000e-01 : f32
    %257 = vector.broadcast %cst_119 : f32 to vector<16x16xf32>
    %258 = arith.mulf %257, %254 : vector<16x16xf32>
    %259 = arith.select %256, %254, %258 : vector<16x16xi1>, vector<16x16xf32>
    %260 = arith.addf %259, %1 : vector<16x16xf32>
    %cst_120 = arith.constant dense<0xFF800000> : vector<16xf32>
    %261 = vector.multi_reduction <maximumf>, %260, %cst_120 [1] : vector<16x16xf32> to vector<16xf32>
    %262 = vector.shape_cast %261 : vector<16xf32> to vector<16x1xf32>
    %263 = vector.broadcast %262 : vector<16x1xf32> to vector<16x16xf32>
    %264 = arith.subf %260, %263 : vector<16x16xf32>
    %265 = math.exp %264 : vector<16x16xf32>
    %cst_121 = arith.constant dense<0.000000e+00> : vector<16xf32>
    %266 = vector.multi_reduction <add>, %265, %cst_121 [1] : vector<16x16xf32> to vector<16xf32>
    %267 = vector.shape_cast %266 : vector<16xf32> to vector<16x1xf32>
    %cst_122 = arith.constant 1.000000e+00 : f32
    %268 = vector.broadcast %cst_122 : f32 to vector<16x1xf32>
    %269 = arith.divf %268, %267 : vector<16x1xf32>
    %270 = vector.broadcast %269 : vector<16x1xf32> to vector<16x16xf32>
    %271 = arith.mulf %265, %270 : vector<16x16xf32>
    %c0_123 = arith.constant 0 : index
    %c0_124 = arith.constant 0 : index
    %c0_125 = arith.constant 0 : index
    %272 = vector.load %arg19[%c0_123, %c0_124, %c0_125] : memref<1x16x16xf32, #tpu.memory_space<vmem>>, vector<1x16x16xf32>
    %273 = vector.shape_cast %272 : vector<1x16x16xf32> to vector<16x16xf32>
    %274 = vector.shape_cast %271 : vector<16x16xf32> to vector<1x16x16xf32>
    tpu.vector_store %arg19[%c0_123, %c0_124, %c0_125], %274 {strides = array<i32>} : memref<1x16x16xf32, #tpu.memory_space<vmem>>, vector<1x16x16xf32>,
    %cst_126 = arith.constant dense<0.000000e+00> : vector<16x8xf32>
    %275 = tpu.matmul %265, %247, %cst_126 {dimension_numbers = #tpu.dot_dimension_numbers<[1], [0], [0], [1], [0, 0, 1, 1], [], []>} : vector<16x16xf32>, vector<16x8xf32>, vector<16x8xf32> -> vector<16x8xf32>
    %276 = vector.broadcast %269 : vector<16x1xf32> to vector<16x8xf32>
    %277 = arith.mulf %275, %276 : vector<16x8xf32>
    %cst_127 = arith.constant 1.000000e+00 : f32
    %278 = vector.broadcast %cst_127 : f32 to vector<16x8xf32>
    %279 = arith.mulf %277, %278 : vector<16x8xf32>
    %c0_128 = arith.constant 0 : index
    %c0_129 = arith.constant 0 : index
    %280 = vector.load %arg13[%c0_128, %c0_129] : memref<1x8xf32, #tpu.memory_space<vmem>>, vector<1x8xf32>
    %281 = vector.broadcast %280 : vector<1x8xf32> to vector<16x8xf32>
    %282 = arith.addf %279, %281 : vector<16x8xf32>
    %c0_130 = arith.constant 0 : index
    %c0_131 = arith.constant 0 : index
    %283 = vector.load %arg15[%c0_130, %c0_131] : memref<16x8xf32, #tpu.memory_space<vmem>>, vector<16x8xf32>
    tpu.vector_store %arg15[%c0_130, %c0_131], %282 {strides = array<i32>} : memref<16x8xf32, #tpu.memory_space<vmem>>, vector<16x8xf32>,
    return
  }
}

</mosaic_0001>

<bundles_post_ra>
// kernel: vgat_encoder_forward.1
= control target key start
LH: loop header
LB: loop body
LE: loop exit
PB: predicated region body
PF: predicated region fallthrough
CT: control target
= control target key end

     0   :  { %s3195_s0 = inlined_call_operand.vmem [shape: f32[16,16], index: 0, kind: input, shape index: {}]   ;;  %s3196_s1 = inlined_call_operand.vmem [shape: f32[16,16], index: 1, kind: input, shape index: {}]   ;;  %s3197_s2 = inlined_call_operand.vmem [shape: f32[16,36], index: 2, kind: input, shape index: {}]   ;;  %s3198_s3 = inlined_call_operand.vmem [shape: f32[4,1,8], index: 3, kind: input, shape index: {}]   ;;  %s3199_s4 = inlined_call_operand.vmem [shape: f32[1,32], index: 4, kind: input, shape index: {}]   ;;  %s3200_s5 = inlined_call_operand.vmem [shape: f32[32,18], index: 5, kind: input, shape index: {}]   ;;  %s3201_s6 = inlined_call_operand.vmem [shape: f32[2,1,8], index: 6, kind: input, shape index: {}]   ;;  %s3202_s7 = inlined_call_operand.vmem [shape: f32[1,8], index: 7, kind: input, shape index: {}]   ;;  %s3203_s8 = inlined_call_operand.vmem [shape: f32[8,9], index: 8, kind: input, shape index: {}]   ;;  %s3204_s9 = inlined_call_operand.vmem [shape: f32[1,1,8], index: 9, kind: input, shape index: {}]   ;;  %s3205_s10 = inlined_call_operand.vmem [shape: f32[1,8], index: 10, kind: input, shape index: {}]   ;;  %s3206_s11 = inlined_call_operand.vmem [shape: f32[8,9], index: 11, kind: input, shape index: {}]   ;;  %s3207_s12 = inlined_call_operand.vmem [shape: f32[1,1,8], index: 12, kind: input, shape index: {}]   ;;  %s3208_s13 = inlined_call_operand.vmem [shape: f32[1,8], index: 13, kind: input, shape index: {}]   ;;  %s3209_s14 = inlined_call_operand.vmem [shape: f32[16,8], index: 14, kind: output, shape index: {0}]   ;;  %s3210_s15 = inlined_call_operand.vmem [shape: f32[16,8], index: 15, kind: output, shape index: {1}]   ;;  %s3211_s16 = inlined_call_operand.hbm [shape: f32[4,16,16], index: 16, kind: output, shape index: {2}]   ;;  %s3212_s17 = inlined_call_operand.hbm [shape: f32[2,16,16], index: 17, kind: output, shape index: {3}]   ;;  %s3213_s18 = inlined_call_operand.hbm [shape: f32[1,16,16], index: 18, kind: output, shape index: {4}]   ;;  %s3214_s19 = inlined_call_operand.hbm [shape: f32[1,16,16], index: 19, kind: output, shape index: {5}]  }
   0x1   :  { %3219 = sst [smem:[#allocation12_spill]] %s3195_s0 }
   0x2   :  { %3220 = sst [smem:[#allocation13_spill]] %s3196_s1 }
   0x3   :  { %3221 = sst [smem:[#allocation14_spill]] %s3197_s2 }
   0x4   :  { %3222 = sst [smem:[#allocation15_spill]] %s3198_s3 }
   0x5   :  { %25 = vsyncpa [#allocation3], 0 }
   0x6   :  { %26 = vsyncpa [#allocation5], 0  ;;  %s3223_s20 = sld [smem:[#allocation14_spill]]  ;;  %vm62_vm0 = vcmask 130048  }
   0x7   :  { %s3224_s23 = sld [smem:[#allocation12_spill]] }
   0xc   :  { %v61_v0 = vld [vmem:[%s3223_s20 + $0x8] sm:$0xff]  ;;  %v60_v1 = vld [vmem:[%s3223_s20] sm:$0xff] }
   0xd   :  { %v56_v2 = vld [vmem:[%s3224_s23] sm:$0xff]  ;;  %2379 = vmatprep.subr.mxu0 %v61_v0 }
   0xe   :  { %2383 = vmatprep.mubr.msk.f32.mxu0 %vm62_vm0, %v56_v2 }
   0xf   :  { %27 = vsyncpa [#allocation8], 0  ;;  %2380 = vmatpush3.msra.mxu0 %v61_v0  ;;  %v57_v3 = vld [vmem:[%s3224_s23 + $0x8] sm:$0xff]  ;;  %v2703_v4 = vmov 0.0   ;;  %v2704_v5 = vmov 32   ;;  %vm2705_vm1 = vmmov 0   ;;  %v233_v13 = vlaneseq }
  0x10   :  { %2381 = vmatprep.subr.mxu0 %v60_v1  ;;  %2386 = vmatprep.subr.mxu1 %v2703_v4  ;;  %vm145_vm2 = vcmask 64512   ;;  %s3225_s27 = sld [smem:[#allocation15_spill]]  ;;  %s2706_s28 = smov 120   ;;  %v2707_v9 = vmov 33   ;;  %v2708_v41 = vmov 34   ;;  %vm1035_vm11 = vcmask 195584  }
  0x11   :  { %2382 = vmatpush3.msra.mxu0 %v60_v1  ;;  %2539 = vset.pattern.permute.xlu0 %v2704_v5  ;;  %v234_v14 = vshrl.u32 %v233_v13, 7  ;;  %s3226_s30 = sld [smem:[#allocation13_spill]]  ;;  %s2709_s2 = smov 112   ;;  %vm1053_vm12 = vcmask 261120  }
  0x12   :  { %2384 = vmatmul.mubr.msk.f32.vlgmr.msra.gmra.mxu0 %vm62_vm0, %v57_v3  ;;  %2390 = vmatprep.mubr.msk.f32.mxu1 %vm2705_vm1, %v2703_v4  ;;  %s2711_s25 = smov 104   ;;  %s2713_s29 = smov 16  }
  0x13   :  { %v2864_v15 = vsub.s32 0, %v234_v14  ;;  %2542 = vset.pattern.permute.xlu1 %v2708_v41  ;;  %s2718_s26 = smov [#allocation4]  }
  0x16   :  { %v144_v8 = vld [vmem:[%s3225_s27] sm:$0x1]  ;;  %v2258_v40 = vld [vmem:[%s3225_s27 + $0x1] sm:$0x1] }
  0x17   :  { %v2870_v21 = vld [vmem:[%s3226_s30] sm:$0xff]  ;;  %v2875_v25 = vld [vmem:[%s3226_s30 + $0x8] sm:$0xff] }
  0xd2   :  { %v2840_v6 = vpop.f32.mrf.mxu0 }
  0xd3   :  { %2387 = vmatpush3.xpose.msk.msra.mxu1 %vm145_vm2, %v2840_v6  ;;  %2393 = vmatprep.subr.mxu0 %v2840_v6 }
  0xd4   :  { %v2845_v7 = vpop.f32.mrf.mxu0  ;;  %2394 = vmatpush3.msra.mxu0 %v2840_v6  ;;  %2388 = vmatprep.subr.mxu1 %v2703_v4 }
  0xd5   :  { %226 = vperm.xlu0 %2539, %v2845_v7   ;;  %2395 = vmatprep.subr.mxu0 %v2845_v7 }
  0xd6   :  { %2396 = vmatpush3.msra.mxu0 %v2845_v7 }
  0xd7   :  { %2389 = vmatpush3.xpose.msk.msra.mxu1 %vm145_vm2, %v2845_v7  ;;  %2400 = vmatprep.subr.mxu0 %v2703_v4 }
  0xd9   :  { %230 = vperm.xlu0 %2539, %v2840_v6  }
  0xda   :  { %2391 = vmatmul.mubr.msk.f32.vlgmr.msra.gmra.mxu1 %vm145_vm2, %v144_v8  ;;  %v2264_v8 = vld [vmem:[%s3225_s27 + $0x2] sm:$0x1] }
  0xdd   :  { %360 = vrot.lane.b32.xlu0 %v2840_v6, %s2706_s28 }
  0xde   :  { %2540 = vset.pattern.permute.xlu0 %v2707_v9  ;;  %v2710_v9 = vmov 35  }
  0xe1   :  { %440 = vperm.xlu0 %2540, %v2845_v7  }
  0xe5   :  { %444 = vperm.xlu0 %2540, %v2840_v6  }
  0xe9   :  { %2541 = vset.pattern.permute.xlu0 %v2708_v41 }
 0x150   :  { %v227_v10 = vpop.permute.xlu0 %226 }
 0x154   :  { %v231_v11 = vpop.permute.xlu0 %230 }
 0x158   :  { %v361_v12 = vpop.permute.xlu0 %360 }
 0x159   :  { %2407 = vmatprep.subr.mxu1 %v361_v12 }
 0x15a   :  { %2408 = vmatpush3.msra.mxu1 %v361_v12 }
 0x15c   :  { %v441_v43 = vpop.permute.xlu0 %440 }
 0x160   :  { %v445_v47 = vpop.permute.xlu0 %444 }
 0x19a   :  { %v221_v16 = vpop.f32.mrf.mxu1 }
 0x19b   :  { %v236_v17 = vrot.slane %v221_v16, %v2864_v15 }
 0x19c   :  { %v2392_v18 = vpop.f32.mrf.mxu1 }
 0x19d   :  { %v237_v19 = vadd.f32 %v236_v17, %v227_v10  ;;  %v238_v20 = vadd.f32 %v236_v17, %v231_v11 }
 0x19f   :  { %v241_v22 = vmul.f32 0.2, %v237_v19  ;;  %v242_v23 = vmul.f32 0.2, %v238_v20  ;;  %vm239_vm3 = vcmp.gt.f32.partialorder %v237_v19, 0.0  ;;  %vm240_vm4 = vcmp.gt.f32.partialorder %v238_v20, 0.0 }
 0x1a1   :  { %v243_v24 = vsel %vm239_vm3, %v237_v19, %v241_v22  ;;  %v244_v26 = vsel %vm240_vm4, %v238_v20, %v242_v23 }
 0x1a2   :  { %v245_v27 = vadd.f32 %v243_v24, %v2870_v21  ;;  %v246_v29 = vadd.f32 %v244_v26, %v2875_v25 }
 0x1a4   :  { %v247_v28 = vsel %vm62_vm0, %v245_v27, -inf  ;;  %v250_v30 = vsel %vm62_vm0, %v246_v29, -inf }
 0x1a5   :  { %248 = vmax.xlane.f32.xlu1 %v247_v28 }
 0x1a9   :  { %251 = vmax.xlane.f32.xlu1 %v250_v30 }
 0x1ba   :  { %358 = vrot.lane.b32.xlu1 %v2845_v7, %s2706_s28 }
 0x22e   :  { %v249_v31 = vpop.xlane.xlu1 %248 }
 0x22f   :  { %v253_v32 = vsub.f32 %v245_v27, %v249_v31 }
 0x231   :  { %v255_v33 = vmul.f32 1.442695, %v253_v32 }
 0x232   :  { %v252_v34 = vpop.xlane.xlu1 %251 }
 0x233   :  { %2551 = vpow2.f32 %v255_v33  ;;  %v254_v35 = vsub.f32 %v246_v29, %v252_v34 }
 0x235   :  { %v257_v36 = vmul.f32 1.442695, %v254_v35 }
 0x236   :  { %v359_v37 = vpop.permute.xlu1 %358 }
 0x237   :  { %2553 = vpow2.f32 %v257_v36  ;;  %2409 = vmatprep.subr.mxu1 %v359_v37 }
 0x238   :  { %2410 = vmatpush3.msra.mxu1 %v359_v37 }
 0x239   :  { %2414 = vmatprep.subr.mxu1 %v2703_v4 }
 0x240   :  { %v2884_v38 = vpop.eup %2551 }
 0x241   :  { %2397 = vmatprep.mubr.msk.f32.mxu0 %vm62_vm0, %v2884_v38 }
 0x244   :  { %v2888_v39 = vpop.eup %2553 }
 0x245   :  { %2398 = vmatmul.mubr.msk.f32.vlgmr.msra.gmra.mxu0 %vm62_vm0, %v2888_v39 }
 0x246   :  { %2401 = vmatpush3.xpose.msk.msra.mxu0 %vm145_vm2, %v361_v12  ;;  %2404 = vmatprep.mubr.msk.f32.mxu0 %vm2705_vm1, %v2703_v4 }
 0x247   :  { %2402 = vmatprep.subr.mxu0 %v2703_v4 }
 0x24a   :  { %2403 = vmatpush3.xpose.msk.msra.mxu0 %vm145_vm2, %v359_v37 }
 0x24d   :  { %2405 = vmatmul.mubr.msk.f32.vlgmr.msra.gmra.mxu0 %vm145_vm2, %v2258_v40 }
 0x305   :  { %v2901_v42 = vpop.f32.mrf.mxu0 }
 0x307   :  { %v2903_v44 = vpop.f32.mrf.mxu0 }
 0x30d   :  { %v435_v45 = vpop.f32.mrf.mxu0 }
 0x30e   :  { %v450_v46 = vrot.slane %v435_v45, %v2864_v15 }
 0x30f   :  { %v2406_v48 = vpop.f32.mrf.mxu0 }
 0x310   :  { %v451_v49 = vadd.f32 %v450_v46, %v441_v43  ;;  %v452_v50 = vadd.f32 %v450_v46, %v445_v47 }
 0x312   :  { %v455_v51 = vmul.f32 0.2, %v451_v49  ;;  %v456_v52 = vmul.f32 0.2, %v452_v50  ;;  %vm454_vm5 = vcmp.gt.f32.partialorder %v452_v50, 0.0  ;;  %vm453_vm6 = vcmp.gt.f32.partialorder %v451_v49, 0.0 }
 0x314   :  { %v458_v53 = vsel %vm454_vm5, %v452_v50, %v456_v52  ;;  %v457_v54 = vsel %vm453_vm6, %v451_v49, %v455_v51 }
 0x315   :  { %v460_v55 = vadd.f32 %v458_v53, %v2875_v25  ;;  %v459_v56 = vadd.f32 %v457_v54, %v2870_v21 }
 0x317   :  { %v464_v57 = vsel %vm62_vm0, %v460_v55, -inf  ;;  %v461_v58 = vsel %vm62_vm0, %v459_v56, -inf }
 0x318   :  { %465 = vmax.xlane.f32.xlu1 %v464_v57  ;;  %462 = vmax.xlane.f32.xlu0 %v461_v58 }
 0x329   :  { %575 = vrot.lane.b32.xlu1 %v2845_v7, %s2709_s2 }
 0x32d   :  { %661 = vperm.xlu1 %2542, %v2840_v6  }
 0x32e   :  { %577 = vrot.lane.b32.xlu0 %v2840_v6, %s2709_s2 }
 0x331   :  { %2543 = vset.pattern.permute.xlu1 %v2710_v9 }
 0x332   :  { %657 = vperm.xlu0 %2541, %v2845_v7  }
 0x336   :  { %2544 = vset.pattern.permute.xlu0 %v2710_v9 }
 0x3a1   :  { %v466_v59 = vpop.xlane.xlu1 %465  ;;  %v463_v60 = vpop.xlane.xlu0 %462 }
 0x3a2   :  { %v468_v61 = vsub.f32 %v460_v55, %v466_v59  ;;  %v467_v62 = vsub.f32 %v459_v56, %v463_v60 }
 0x3a4   :  { %v471_v63 = vmul.f32 1.442695, %v468_v61  ;;  %v469_v0 = vmul.f32 1.442695, %v467_v62 }
 0x3a5   :  { %v578_v1 = vpop.permute.xlu0 %577  ;;  %v576_v2 = vpop.permute.xlu1 %575 }
 0x3a6   :  { %2555 = vpow2.f32 %v471_v63  ;;  %2421 = vmatprep.subr.mxu0 %v578_v1 }
 0x3a7   :  { %2557 = vpow2.f32 %v469_v0  ;;  %2422 = vmatpush3.msra.mxu0 %v578_v1 }
 0x3a8   :  { %2423 = vmatprep.subr.mxu0 %v576_v2 }
 0x3a9   :  { %2424 = vmatpush3.msra.mxu0 %v576_v2  ;;  %v662_v13 = vpop.permute.xlu1 %661 }
 0x3aa   :  { %2428 = vmatprep.subr.mxu0 %v2703_v4 }
 0x3ad   :  { %v658_v16 = vpop.permute.xlu0 %657 }
 0x3b3   :  { %v2915_v3 = vpop.eup %2555 }
 0x3b4   :  { %v2917_v5 = vpop.eup %2557  ;;  %v476_v60 = vsel %vm62_vm0, %v2915_v3, 0.0 }
 0x3b5   :  { %2411 = vmatprep.mubr.msk.f32.mxu1 %vm62_vm0, %v2917_v5  ;;  %v473_v61 = vsel %vm62_vm0, %v2917_v5, 0.0 }
 0x3b6   :  { %2412 = vmatmul.mubr.msk.f32.vlgmr.msra.gmra.mxu1 %vm62_vm0, %v2915_v3 }
 0x3b7   :  { %2415 = vmatpush3.xpose.msk.msra.mxu1 %vm145_vm2, %v578_v1  ;;  %2418 = vmatprep.mubr.msk.f32.mxu1 %vm2705_vm1, %v2703_v4 }
 0x3b8   :  { %2416 = vmatprep.subr.mxu1 %v2703_v4 }
 0x3bb   :  { %2417 = vmatpush3.xpose.msk.msra.mxu1 %vm145_vm2, %v576_v2 }
 0x3be   :  { %2419 = vmatmul.mubr.msk.f32.vlgmr.msra.gmra.mxu1 %vm145_vm2, %v2264_v8 }
 0x476   :  { %v2932_v10 = vpop.f32.mrf.mxu1 }
 0x478   :  { %v2934_v11 = vpop.f32.mrf.mxu1 }
 0x47e   :  { %v652_v12 = vpop.f32.mrf.mxu1 }
 0x47f   :  { %v667_v14 = vrot.slane %v652_v12, %v2864_v15 }
 0x480   :  { %v2420_v17 = vpop.f32.mrf.mxu1 }
 0x481   :  { %v668_v18 = vadd.f32 %v667_v14, %v658_v16  ;;  %v669_v19 = vadd.f32 %v667_v14, %v662_v13 }
 0x483   :  { %v672_v20 = vmul.f32 0.2, %v668_v18  ;;  %v673_v22 = vmul.f32 0.2, %v669_v19  ;;  %vm671_vm7 = vcmp.gt.f32.partialorder %v669_v19, 0.0  ;;  %vm670_vm8 = vcmp.gt.f32.partialorder %v668_v18, 0.0 }
 0x485   :  { %v675_v23 = vsel %vm671_vm7, %v669_v19, %v673_v22  ;;  %v674_v24 = vsel %vm670_vm8, %v668_v18, %v672_v20 }
 0x486   :  { %v677_v26 = vadd.f32 %v675_v23, %v2875_v25  ;;  %v676_v27 = vadd.f32 %v674_v24, %v2870_v21 }
 0x488   :  { %v681_v28 = vsel %vm62_vm0, %v677_v26, -inf  ;;  %v678_v29 = vsel %vm62_vm0, %v676_v27, -inf }
 0x489   :  { %682 = vmax.xlane.f32.xlu0 %v681_v28  ;;  %679 = vmax.xlane.f32.xlu1 %v678_v29 }
 0x49a   :  { %792 = vrot.lane.b32.xlu1 %v2845_v7, %s2711_s25 }
 0x49e   :  { %874 = vperm.xlu1 %2543, %v2845_v7  }
 0x49f   :  { %794 = vrot.lane.b32.xlu0 %v2840_v6, %s2711_s25  ;;  %s2714_s25 = smov 24  }
 0x4a3   :  { %878 = vperm.xlu0 %2544, %v2840_v6   ;;  %v2270_v6 = vld [vmem:[%s3225_s27 + $0x3] sm:$0x1]  ;;  %s2712_s27 = smov 8  }
 0x512   :  { %v683_v30 = vpop.xlane.xlu0 %682  ;;  %v680_v31 = vpop.xlane.xlu1 %679 }
 0x513   :  { %v685_v32 = vsub.f32 %v677_v26, %v683_v30  ;;  %v684_v33 = vsub.f32 %v676_v27, %v680_v31  ;;  %v262_v31 = vsel %vm62_vm0, %v2888_v39, 0.0 }
 0x515   :  { %v688_v34 = vmul.f32 1.442695, %v685_v32  ;;  %v686_v35 = vmul.f32 1.442695, %v684_v33 }
 0x516   :  { %v795_v36 = vpop.permute.xlu0 %794  ;;  %v793_v37 = vpop.permute.xlu1 %792 }
 0x517   :  { %2559 = vpow2.f32 %v688_v34  ;;  %2435 = vmatprep.subr.mxu1 %v795_v36 }
 0x518   :  { %2561 = vpow2.f32 %v686_v35  ;;  %2436 = vmatpush3.msra.mxu1 %v795_v36 }
 0x519   :  { %2437 = vmatprep.subr.mxu1 %v793_v37 }
 0x51a   :  { %2438 = vmatpush3.msra.mxu1 %v793_v37  ;;  %v875_v46 = vpop.permute.xlu1 %874 }
 0x51e   :  { %v879_v48 = vpop.permute.xlu0 %878 }
 0x524   :  { %v2945_v40 = vpop.eup %2559 }
 0x525   :  { %v2947_v7 = vpop.eup %2561  ;;  %v693_v62 = vsel %vm62_vm0, %v2945_v40, 0.0 }
 0x526   :  { %2425 = vmatprep.mubr.msk.f32.mxu0 %vm62_vm0, %v2947_v7  ;;  %v690_v63 = vsel %vm62_vm0, %v2947_v7, 0.0 }
 0x527   :  { %2426 = vmatmul.mubr.msk.f32.vlgmr.msra.gmra.mxu0 %vm62_vm0, %v2945_v40 }
 0x528   :  { %2429 = vmatpush3.xpose.msk.msra.mxu0 %vm145_vm2, %v795_v36  ;;  %2432 = vmatprep.mubr.msk.f32.mxu0 %vm2705_vm1, %v2703_v4 }
 0x529   :  { %2430 = vmatprep.subr.mxu0 %v2703_v4 }
 0x52c   :  { %2431 = vmatpush3.xpose.msk.msra.mxu0 %vm145_vm2, %v793_v37 }
 0x52d   :  { %2453 = vmatprep.subr.mxu0 %v2703_v4 }
 0x52f   :  { %2433 = vmatmul.mubr.msk.f32.vlgmr.msra.gmra.mxu0 %vm145_vm2, %v2270_v6 }
 0x530   :  { %2457 = vmatprep.mubr.msk.f32.mxu0 %vm2705_vm1, %v2703_v4 }
 0x5e7   :  { %v2965_v41 = vpop.f32.mrf.mxu0 }
 0x5e9   :  { %v2967_v43 = vpop.f32.mrf.mxu0 }
 0x5ef   :  { %v869_v45 = vpop.f32.mrf.mxu0 }
 0x5f0   :  { %v884_v47 = vrot.slane %v869_v45, %v2864_v15 }
 0x5f1   :  { %v2434_v49 = vpop.f32.mrf.mxu0 }
 0x5f2   :  { %v885_v50 = vadd.f32 %v884_v47, %v875_v46  ;;  %v886_v51 = vadd.f32 %v884_v47, %v879_v48  ;;  %v1052_v48 = vld [vmem:[%s3200_s5 + $0x18] sm:$0xff]  ;;  %v1051_v49 = vld [vmem:[%s3200_s5 + $0x10] sm:$0xff] }
 0x5f3   :  { %2442 = vmatprep.subr.mxu1 %v1052_v48 }
 0x5f4   :  { %v889_v52 = vmul.f32 0.2, %v885_v50  ;;  %v890_v53 = vmul.f32 0.2, %v886_v51  ;;  %vm888_vm9 = vcmp.gt.f32.partialorder %v886_v51, 0.0  ;;  %vm887_vm10 = vcmp.gt.f32.partialorder %v885_v50, 0.0 }
 0x5f6   :  { %v892_v54 = vsel %vm888_vm9, %v886_v51, %v890_v53  ;;  %v891_v55 = vsel %vm887_vm10, %v885_v50, %v889_v52 }
 0x5f7   :  { %v894_v56 = vadd.f32 %v892_v54, %v2875_v25  ;;  %v893_v57 = vadd.f32 %v891_v55, %v2870_v21 }
 0x5f9   :  { %v898_v58 = vsel %vm62_vm0, %v894_v56, -inf  ;;  %v895_v59 = vsel %vm62_vm0, %v893_v57, -inf }
 0x5fa   :  { %899 = vmax.xlane.f32.xlu0 %v898_v58  ;;  %896 = vmax.xlane.f32.xlu1 %v895_v59 }
 0x5fe   :  { %477 = vadd.xlane.f32.xlu0 %v476_v60  ;;  %474 = vadd.xlane.f32.xlu1 %v473_v61 }
 0x602   :  { %694 = vadd.xlane.f32.xlu0 %v693_v62  ;;  %691 = vadd.xlane.f32.xlu1 %v690_v63  ;;  %v2276_v63 = vld [vmem:[%s3199_s4] ss:$0 sm:$0xff] }
 0x683   :  { %v900_v0 = vpop.xlane.xlu0 %899  ;;  %v897_v1 = vpop.xlane.xlu1 %896 }
 0x684   :  { %v902_v2 = vsub.f32 %v894_v56, %v900_v0  ;;  %v901_v8 = vsub.f32 %v893_v57, %v897_v1 }
 0x686   :  { %v905_v9 = vmul.f32 1.442695, %v902_v2  ;;  %v903_v12 = vmul.f32 1.442695, %v901_v8 }
 0x687   :  { %v478_v13 = vpop.xlane.xlu0 %477  ;;  %v475_v14 = vpop.xlane.xlu1 %474 }
 0x688   :  { %2563 = vpow2.f32 %v905_v9 }
 0x689   :  { %2565 = vpow2.f32 %v903_v12 }
 0x68a   :  { %2567 = vrcp.f32 %v478_v13 }
 0x68b   :  { %2569 = vrcp.f32 %v475_v14  ;;  %v695_v16 = vpop.xlane.xlu0 %694  ;;  %v692_v17 = vpop.xlane.xlu1 %691  ;;  %v2715_v14 = vmov 16  }
 0x68c   :  { %2571 = vrcp.f32 %v695_v16  ;;  %2546 = vset.pattern.permute.xlu0 %v2715_v14  ;;  %2545 = vset.pattern.permute.xlu1 %v2715_v14 }
 0x68d   :  { %2573 = vrcp.f32 %v692_v17 }
 0x695   :  { %v2564_v18 = vpop.eup %2563 }
 0x696   :  { %v2566_v19 = vpop.eup %2565  ;;  %v910_v20 = vsel %vm62_vm0, %v2564_v18, 0.0 }
 0x697   :  { %v2568_v22 = vpop.eup %2567  ;;  %2439 = vmatprep.mubr.msk.f32.mxu1 %vm62_vm0, %v2566_v19  ;;  %911 = vadd.xlane.f32.xlu0 %v910_v20  ;;  %v907_v23 = vsel %vm62_vm0, %v2566_v19, 0.0 }
 0x698   :  { %v2570_v24 = vpop.eup %2569  ;;  %v484_v26 = vmul.f32 %v2568_v22, %v2915_v3  ;;  %2440 = vmatmul.mubr.msk.f32.vlgmr.msra.gmra.mxu1 %vm62_vm0, %v2564_v18  ;;  %908 = vadd.xlane.f32.xlu1 %v907_v23  ;;  %v259_v3 = vsel %vm62_vm0, %v2884_v38, 0.0  ;;  %v572_v34 = vmul.f32 %v2568_v22, %v2932_v10  ;;  %v2284_v23 = vld [vmem:[%s3201_s6 + $0x1] sm:$0x1] }
 0x699   :  { %v2572_v27 = vpop.eup %2571  ;;  %v483_v28 = vmul.f32 %v2570_v24, %v2917_v5  ;;  %v571_v5 = vmul.f32 %v2570_v24, %v2934_v11  ;;  %2443 = vmatpush3.msra.mxu1 %v1052_v48 }
 0x69a   :  { %v2574_v29 = vpop.eup %2573  ;;  %487 = vst.msk [vmem:[#allocation2 + $0x18] sm:$0xff] %vm62_vm0, %v484_v26  ;;  %v701_v30 = vmul.f32 %v2572_v27, %v2945_v40  ;;  %v789_v35 = vmul.f32 %v2572_v27, %v2965_v41  ;;  %2444 = vmatprep.subr.mxu1 %v1051_v49 }
 0x69b   :  { %486 = vst.msk [vmem:[#allocation2 + $0x10] sm:$0xff] %vm62_vm0, %v483_v28  ;;  %v700_v32 = vmul.f32 %v2574_v29, %v2947_v7  ;;  %263 = vadd.xlane.f32.xlu0 %v262_v31  ;;  %v788_v33 = vmul.f32 %v2574_v29, %v2967_v43  ;;  %2445 = vmatpush3.msra.mxu1 %v1051_v49 }
 0x69c   :  { %704 = vst.msk [vmem:[#allocation2 + $0x28] sm:$0xff] %vm62_vm0, %v701_v30  ;;  %260 = vadd.xlane.f32.xlu1 %v259_v3 }
 0x69d   :  { %703 = vst.msk [vmem:[#allocation2 + $0x20] sm:$0xff] %vm62_vm0, %v700_v32 }
 0x6ad   :  { %1009 = vrot.lane.b32.xlu1 %v571_v5, %s2712_s27 }
 0x6b1   :  { %1017 = vrot.lane.b32.xlu1 %v788_v33, %s2713_s29  ;;  %1011 = vrot.lane.b32.xlu0 %v572_v34, %s2712_s27 }
 0x6b5   :  { %1019 = vrot.lane.b32.xlu1 %v789_v35, %s2713_s29 }
 0x720   :  { %v912_v36 = vpop.xlane.xlu0 %911 }
 0x721   :  { %2575 = vrcp.f32 %v912_v36  ;;  %v909_v37 = vpop.xlane.xlu1 %908 }
 0x722   :  { %2577 = vrcp.f32 %v909_v37 }
 0x724   :  { %v264_v40 = vpop.xlane.xlu0 %263 }
 0x725   :  { %2579 = vrcp.f32 %v264_v40  ;;  %v261_v11 = vpop.xlane.xlu1 %260 }
 0x726   :  { %2581 = vrcp.f32 %v261_v11 }
 0x728   :  { %v1012_v58 = vpop.permute.xlu0 %1011 }
 0x729   :  { %v1010_v54 = vpop.permute.xlu1 %1009 }
 0x72d   :  { %v1018_v55 = vpop.permute.xlu1 %1017 }
 0x72e   :  { %v2576_v7 = vpop.eup %2575 }
 0x72f   :  { %v2578_v6 = vpop.eup %2577  ;;  %v918_v43 = vmul.f32 %v2576_v7, %v2564_v18  ;;  %v1135_v18 = vld [vmem:[%s3201_s6] sm:$0x1] }
 0x730   :  { %v917_v45 = vmul.f32 %v2578_v6, %v2566_v19  ;;  %v2716_v19 = vmov 17  }
 0x731   :  { %921 = vst.msk [vmem:[#allocation2 + $0x38] sm:$0xff] %vm62_vm0, %v918_v43  ;;  %v1020_v59 = vpop.permute.xlu1 %1019 }
 0x732   :  { %v2580_v10 = vpop.eup %2579  ;;  %920 = vst.msk [vmem:[#allocation2 + $0x30] sm:$0xff] %vm62_vm0, %v917_v45 }
 0x733   :  { %v2582_v46 = vpop.eup %2581  ;;  %v270_v41 = vmul.f32 %v2580_v10, %v2888_v39  ;;  %v1049_v39 = vld [vmem:[%s3200_s5] sm:$0xff]  ;;  %v355_v56 = vmul.f32 %v2580_v10, %v2901_v42 }
 0x734   :  { %v269_v47 = vmul.f32 %v2582_v46, %v2884_v38  ;;  %v1050_v38 = vld [vmem:[%s3200_s5 + $0x8] sm:$0xff]  ;;  %v354_v57 = vmul.f32 %v2582_v46, %v2903_v44 }
 0x735   :  { %272 = vst.msk [vmem:[#allocation2 + $0x8] sm:$0xff] %vm62_vm0, %v270_v41  ;;  %2446 = vmatprep.subr.mxu1 %v1050_v38  ;;  %v1032_v60 = vsel %vm145_vm2, %v355_v56, %v1012_v58 }
 0x736   :  { %271 = vst.msk [vmem:[#allocation2] sm:$0xff] %vm62_vm0, %v269_v47  ;;  %2447 = vmatpush3.msra.mxu1 %v1050_v38  ;;  %v1031_v61 = vsel %vm145_vm2, %v354_v57, %v1010_v54  ;;  %v1034_v62 = vsel %vm62_vm0, %v1032_v60, %v1020_v59 }
 0x737   :  { %2448 = vmatprep.subr.mxu1 %v1049_v39  ;;  %v1033_v2 = vsel %vm62_vm0, %v1031_v61, %v1018_v55 }
 0x738   :  { %2449 = vmatpush3.msra.mxu1 %v1049_v39 }
 0x758   :  { %v2441_v50 = vpop.f32.mrf.mxu1 }
 0x759   :  { %v1006_v51 = vmul.f32 %v2576_v7, %v2441_v50 }
 0x75a   :  { %v996_v52 = vpop.f32.mrf.mxu1 }
 0x75b   :  { %v1005_v53 = vmul.f32 %v2578_v6, %v996_v52  ;;  %1027 = vrot.lane.b32.xlu1 %v1006_v51, %s2714_s25 }
 0x75d   :  { %1025 = vrot.lane.b32.xlu0 %v1005_v53, %s2714_s25 }
 0x7cd   :  { %v1028_v0 = vpop.permute.xlu1 %1027 }
 0x7ce   :  { %v1037_v1 = vsel %vm1035_vm11, %v1034_v62, %v1028_v0 }
 0x7cf   :  { %v1026_v42 = vpop.permute.xlu0 %1025  ;;  %v1046_v8 = vadd.f32 %v2276_v63, %v1037_v1 }
 0x7d0   :  { %v1036_v44 = vsel %vm1035_vm11, %v1033_v2, %v1026_v42 }
 0x7d1   :  { %v1045_v9 = vadd.f32 %v2276_v63, %v1036_v44  ;;  %v1048_v13 = vmax.f32 %v1046_v8, 0.0 }
 0x7d3   :  { %v1047_v12 = vmax.f32 %v1045_v9, 0.0 }
 0x7d5   :  { %2450 = vmatprep.mubr.msk.f32.mxu1 %vm1053_vm12, %v1047_v12 }
 0x7d6   :  { %2451 = vmatmul.mubr.msk.f32.vlgmr.msra.gmra.mxu1 %vm1053_vm12, %v1048_v13 }
 0x896   :  { %v2452_v16 = vpop.f32.mrf.mxu1 }
 0x897   :  { %1350 = vrot.lane.b32.xlu0 %v2452_v16, %s2706_s28  ;;  %2454 = vmatpush3.xpose.msk.msra.mxu0 %vm145_vm2, %v2452_v16 }
 0x898   :  { %2460 = vmatprep.subr.mxu1 %v2452_v16  ;;  %v1126_v17 = vpop.f32.mrf.mxu1  ;;  %2455 = vmatprep.subr.mxu0 %v2703_v4 }
 0x899   :  { %2461 = vmatpush3.msra.mxu1 %v2452_v16  ;;  %1348 = vrot.lane.b32.xlu1 %v1126_v17, %s2706_s28  ;;  %s2201_s28 = sshll.u32 %s2718_s26, 4  ;;  %s2202_s28 = int_to_ptr.vmem [resolvable:$true] %s2201_s28 }
 0x89a   :  { %2462 = vmatprep.subr.mxu1 %v1126_v17  ;;  %s2617_s29 = scalar_lea.vmem %s2202_s28, 512  ;;  %p2622_p1 = scmp.lt.s32.totalorder %s2202_s28, %s2202_s28 }
 0x89b   :  { %2463 = vmatpush3.msra.mxu1 %v1126_v17  ;;  %1216 = vperm.xlu0 %2546, %v1126_v17   ;;  %p2618_p0 = scmp.ne.s32.totalorder %s2202_s28, %s2617_s29  ;;  %p2623_p2 = scmp.lt.s32.totalorder %s2617_s29, %s2617_s29 }
 0x89c   :  { %2456 = vmatpush3.xpose.msk.msra.mxu0 %vm145_vm2, %v1126_v17 }
 0x89d   :  { %1220 = vperm.xlu1 %2545, %v2452_v16   ;;  %2467 = vmatprep.subr.mxu0 %v2703_v4  ;;  %p2624_p3 = por %p2623_p2, %p2622_p1 }
 0x89f   :  { %2458 = vmatmul.mubr.msk.f32.vlgmr.msra.gmra.mxu0 %vm145_vm2, %v1135_v18  ;;  %2548 = vset.pattern.permute.xlu0 %v2716_v19  ;;  %p2625_p4 = pnand %p2624_p3, %p2618_p0 }
 0x8a0   :  { %1434 = vperm.xlu0 %2548, %v2452_v16   ;;  %2471 = vmatprep.mubr.msk.f32.mxu0 %vm2705_vm1, %v2703_v4 }
 0x8a1   :  { %2547 = vset.pattern.permute.xlu1 %v2716_v19  ;;  %v1578_v19 = vld [vmem:[%s3203_s8] sm:$0xff] }
 0x8a2   :  { %1430 = vperm.xlu1 %2547, %v1126_v17  }
 0x909   :  { %v1351_v20 = vpop.permute.xlu0 %1350 }
 0x90a   :  { %2468 = vmatpush3.xpose.msk.msra.mxu0 %vm145_vm2, %v1351_v20  ;;  %2474 = vmatprep.subr.mxu1 %v1351_v20 }
 0x90b   :  { %2469 = vmatprep.subr.mxu0 %v2703_v4  ;;  %v1349_v22 = vpop.permute.xlu1 %1348 }
 0x90e   :  { %2470 = vmatpush3.xpose.msk.msra.mxu0 %vm145_vm2, %v1349_v22 }
 0x90f   :  { %2486 = vmatprep.subr.mxu0 %v2703_v4 }
 0x911   :  { %2472 = vmatmul.mubr.msk.f32.vlgmr.msra.gmra.mxu0 %vm145_vm2, %v2284_v23 }
 0x912   :  { %2490 = vmatprep.mubr.msk.f32.mxu0 %vm2705_vm1, %v2703_v4 }
 0x916   :  { %v1217_v26 = vpop.permute.xlu0 %1216 }
 0x918   :  { %v1221_v28 = vpop.permute.xlu1 %1220 }
 0x91b   :  { %v1435_v11 = vpop.permute.xlu0 %1434 }
 0x91d   :  { %v1431_v6 = vpop.permute.xlu1 %1430 }
 0x95f   :  { %v1211_v24 = vpop.f32.mrf.mxu0 }
 0x960   :  { %v1226_v27 = vrot.slane %v1211_v24, %v2864_v15 }
 0x961   :  { %v2459_v29 = vpop.f32.mrf.mxu0 }
 0x962   :  { %v1227_v30 = vadd.f32 %v1226_v27, %v1217_v26  ;;  %v1228_v31 = vadd.f32 %v1226_v27, %v1221_v28 }
 0x964   :  { %v1231_v32 = vmul.f32 0.2, %v1227_v30  ;;  %v1232_v3 = vmul.f32 0.2, %v1228_v31  ;;  %vm1230_vm13 = vcmp.gt.f32.partialorder %v1228_v31, 0.0  ;;  %vm1229_vm14 = vcmp.gt.f32.partialorder %v1227_v30, 0.0 }
 0x966   :  { %v1234_v5 = vsel %vm1230_vm13, %v1228_v31, %v1232_v3  ;;  %v1233_v33 = vsel %vm1229_vm14, %v1227_v30, %v1231_v32 }
 0x967   :  { %v1236_v34 = vadd.f32 %v1234_v5, %v2875_v25  ;;  %v1235_v35 = vadd.f32 %v1233_v33, %v2870_v21 }
 0x969   :  { %v1240_v36 = vsel %vm62_vm0, %v1236_v34, -inf  ;;  %v1237_v37 = vsel %vm62_vm0, %v1235_v35, -inf }
 0x96a   :  { %1241 = vmax.xlane.f32.xlu0 %v1240_v36  ;;  %1238 = vmax.xlane.f32.xlu1 %v1237_v37  ;;  %v2290_v37 = vld [vmem:[%s3202_s7] ss:$0 sm:$0xff] }
 0x9d1   :  { %v1425_v40 = vpop.f32.mrf.mxu0 }
 0x9d2   :  { %v1440_v7 = vrot.slane %v1425_v40, %v2864_v15 }
 0x9d3   :  { %v2473_v43 = vpop.f32.mrf.mxu0 }
 0x9d4   :  { %v1441_v45 = vadd.f32 %v1440_v7, %v1431_v6  ;;  %v1442_v10 = vadd.f32 %v1440_v7, %v1435_v11 }
 0x9d6   :  { %v1445_v46 = vmul.f32 0.2, %v1441_v45  ;;  %v1446_v41 = vmul.f32 0.2, %v1442_v10  ;;  %vm1444_vm15 = vcmp.gt.f32.partialorder %v1442_v10, 0.0  ;;  %vm1443_vm3 = vcmp.gt.f32.partialorder %v1441_v45, 0.0 }
 0x9d8   :  { %v1448_v47 = vsel %vm1444_vm15, %v1442_v10, %v1446_v41  ;;  %v1447_v48 = vsel %vm1443_vm3, %v1441_v45, %v1445_v46  ;;  %v1660_v41 = vld [vmem:[%s3204_s9] sm:$0x1] }
 0x9d9   :  { %v1450_v49 = vadd.f32 %v1448_v47, %v2875_v25  ;;  %v1449_v38 = vadd.f32 %v1447_v48, %v2870_v21 }
 0x9db   :  { %v1454_v39 = vsel %vm62_vm0, %v1450_v49, -inf  ;;  %v1451_v50 = vsel %vm62_vm0, %v1449_v38, -inf }
 0x9dc   :  { %1455 = vmax.xlane.f32.xlu0 %v1454_v39  ;;  %1452 = vmax.xlane.f32.xlu1 %v1451_v50 }
 0x9f3   :  { %v1242_v51 = vpop.xlane.xlu0 %1241  ;;  %v1239_v52 = vpop.xlane.xlu1 %1238 }
 0x9f4   :  { %v1244_v53 = vsub.f32 %v1236_v34, %v1242_v51  ;;  %v1243_v54 = vsub.f32 %v1235_v35, %v1239_v52 }
 0x9f6   :  { %v1247_v55 = vmul.f32 1.442695, %v1244_v53  ;;  %v1245_v56 = vmul.f32 1.442695, %v1243_v54 }
 0x9f8   :  { %2583 = vpow2.f32 %v1247_v55 }
 0x9f9   :  { %2585 = vpow2.f32 %v1245_v56 }
 0xa05   :  { %v2584_v57 = vpop.eup %2583 }
 0xa06   :  { %v2586_v58 = vpop.eup %2585  ;;  %v1252_v60 = vsel %vm62_vm0, %v2584_v57, 0.0 }
 0xa07   :  { %2464 = vmatprep.mubr.msk.f32.mxu1 %vm62_vm0, %v2586_v58  ;;  %v1249_v59 = vsel %vm62_vm0, %v2586_v58, 0.0 }
 0xa08   :  { %2465 = vmatmul.mubr.msk.f32.vlgmr.msra.gmra.mxu1 %vm62_vm0, %v2584_v57  ;;  %1250 = vadd.xlane.f32.xlu1 %v1249_v59 }
 0xa09   :  { %2475 = vmatpush3.msra.mxu1 %v1351_v20  ;;  %v2717_v20 = vmov 8  }
 0xa0a   :  { %2476 = vmatprep.subr.mxu1 %v1349_v22  ;;  %2550 = vset.pattern.permute.xlu0 %v2717_v20 }
 0xa0b   :  { %2477 = vmatpush3.msra.mxu1 %v1349_v22  ;;  %2549 = vset.pattern.permute.xlu1 %v2717_v20 }
 0xa0c   :  { %1253 = vadd.xlane.f32.xlu1 %v1252_v60  ;;  %2481 = vmatprep.subr.mxu1 %v1578_v19  ;;  %v1882_v60 = vld [vmem:[%s3206_s11] sm:$0xff] }
 0xa65   :  { %v1456_v61 = vpop.xlane.xlu0 %1455  ;;  %v1453_v62 = vpop.xlane.xlu1 %1452 }
 0xa66   :  { %v1458_v63 = vsub.f32 %v1450_v49, %v1456_v61  ;;  %v1457_v0 = vsub.f32 %v1449_v38, %v1453_v62 }
 0xa68   :  { %v1461_v1 = vmul.f32 1.442695, %v1458_v63  ;;  %v1459_v2 = vmul.f32 1.442695, %v1457_v0 }
 0xa6a   :  { %2587 = vpow2.f32 %v1461_v1 }
 0xa6b   :  { %2589 = vpow2.f32 %v1459_v2 }
 0xa77   :  { %v2588_v42 = vpop.eup %2587 }
 0xa78   :  { %v2590_v8 = vpop.eup %2589  ;;  %v1466_v9 = vsel %vm62_vm0, %v2588_v42, 0.0 }
 0xa79   :  { %2478 = vmatprep.mubr.msk.f32.mxu1 %vm62_vm0, %v2590_v8  ;;  %v1463_v44 = vsel %vm62_vm0, %v2590_v8, 0.0 }
 0xa7a   :  { %2479 = vmatmul.mubr.msk.f32.vlgmr.msra.gmra.mxu1 %vm62_vm0, %v2588_v42  ;;  %1464 = vadd.xlane.f32.xlu0 %v1463_v44 }
 0xa7b   :  { %2482 = vmatpush3.msra.mxu1 %v1578_v19 }
 0xa7e   :  { %1467 = vadd.xlane.f32.xlu0 %v1466_v9 }
 0xa91   :  { %v1251_v12 = vpop.xlane.xlu1 %1250 }
 0xa92   :  { %2591 = vrcp.f32 %v1251_v12  ;;  %v1958_v12 = vld [vmem:[%s3207_s12] sm:$0x1] }
 0xa95   :  { %v1254_v13 = vpop.xlane.xlu1 %1253 }
 0xa96   :  { %2593 = vrcp.f32 %v1254_v13 }
 0xa9f   :  { %v2592_v14 = vpop.eup %2591 }
 0xaa0   :  { %v1259_v16 = vmul.f32 %v2592_v14, %v2586_v58 }
 0xaa2   :  { %1261 = vst.msk [vmem:[#allocation4] sm:$0xff] %vm62_vm0, %v1259_v16 }
 0xaa3   :  { %v2594_v17 = vpop.eup %2593 }
 0xaa4   :  { %v1260_v18 = vmul.f32 %v2594_v17, %v2584_v57 }
 0xaa6   :  { %1262 = vst.msk [vmem:[#allocation4 + $0x8] sm:$0xff] %vm62_vm0, %v1260_v18 }
 0xac8   :  { %v2466_v29 = vpop.f32.mrf.mxu1 }
 0xac9   :  { %v1345_v32 = vmul.f32 %v2594_v17, %v2466_v29 }
 0xaca   :  { %v1335_v30 = vpop.f32.mrf.mxu1 }
 0xacb   :  { %v1344_v33 = vmul.f32 %v2592_v14, %v1335_v30 }
 0xb03   :  { %v1465_v22 = vpop.xlane.xlu0 %1464 }
 0xb04   :  { %2595 = vrcp.f32 %v1465_v22 }
 0xb07   :  { %v1468_v23 = vpop.xlane.xlu0 %1467 }
 0xb08   :  { %2597 = vrcp.f32 %v1468_v23 }
 0xb11   :  { %v2596_v24 = vpop.eup %2595 }
 0xb12   :  { %v1473_v26 = vmul.f32 %v2596_v24, %v2590_v8 }
 0xb14   :  { %1476 = vst.msk [vmem:[#allocation4 + $0x10] sm:$0xff] %vm62_vm0, %v1473_v26  ;;  %v2615_v26 = vld [vmem:[%s3226_s30 + $0x8] sm:$0xff] }
 0xb15   :  { %v2598_v27 = vpop.eup %2597 }
 0xb16   :  { %v1474_v28 = vmul.f32 %v2598_v27, %v2588_v42 }
 0xb18   :  { %1477 = vst.msk [vmem:[#allocation4 + $0x18] sm:$0xff] %vm62_vm0, %v1474_v28  ;;  %v2616_v28 = vld [vmem:[%s3226_s30] sm:$0xff] }
 0xb3a   :  { %v2480_v31 = vpop.f32.mrf.mxu1 }
 0xb3b   :  { %v1562_v3 = vmul.f32 %v2598_v27, %v2480_v31 }
 0xb3c   :  { %v1552_v5 = vpop.f32.mrf.mxu1 }
 0xb3d   :  { %v1564_v34 = vadd.f32 %v1562_v3, %v1345_v32  ;;  %v1561_v35 = vmul.f32 %v2596_v24, %v1552_v5 }
 0xb3f   :  { %v1566_v36 = vmul.f32 0.5, %v1564_v34  ;;  %v1563_v40 = vadd.f32 %v1561_v35, %v1344_v33 }
 0xb41   :  { %v1565_v11 = vmul.f32 0.5, %v1563_v40  ;;  %v1575_v7 = vadd.f32 %v2290_v37, %v1566_v36 }
 0xb43   :  { %v1574_v6 = vadd.f32 %v2290_v37, %v1565_v11  ;;  %v1577_v45 = vmax.f32 %v1575_v7, 0.0 }
 0xb45   :  { %v1576_v43 = vmax.f32 %v1574_v6, 0.0 }
 0xb47   :  { %2483 = vmatprep.mubr.msk.f32.mxu1 %vm145_vm2, %v1576_v43 }
 0xb48   :  { %2484 = vmatmul.mubr.msk.f32.vlgmr.msra.gmra.mxu1 %vm145_vm2, %v1577_v45 }
 0xc08   :  { %v2485_v10 = vpop.f32.mrf.mxu1 }
 0xc09   :  { %1745 = vperm.xlu0 %2550, %v2485_v10   ;;  %2487 = vmatpush3.xpose.msk.msra.mxu0 %vm145_vm2, %v2485_v10 }
 0xc0a   :  { %2493 = vmatprep.subr.mxu1 %v2485_v10  ;;  %v1651_v46 = vpop.f32.mrf.mxu1  ;;  %2488 = vmatprep.subr.mxu0 %v2703_v4 }
 0xc0b   :  { %2494 = vmatpush3.msra.mxu1 %v2485_v10  ;;  %1741 = vperm.xlu1 %2549, %v1651_v46  }
 0xc0c   :  { %2495 = vmatprep.subr.mxu1 %v1651_v46 }
 0xc0d   :  { %2496 = vmatpush3.msra.mxu1 %v1651_v46  ;;  %2489 = vmatpush3.xpose.msk.msra.mxu0 %vm145_vm2, %v1651_v46 }
 0xc0e   :  { %2505 = vmatprep.subr.mxu0 %v2703_v4  ;;  %2500 = vmatprep.subr.mxu1 %v1882_v60 }
 0xc10   :  { %2491 = vmatmul.mubr.msk.f32.vlgmr.msra.gmra.mxu0 %vm145_vm2, %v1660_v41 }
 0xc11   :  { %2509 = vmatprep.mubr.msk.f32.mxu0 %vm2705_vm1, %v2703_v4 }
 0xc84   :  { %v1746_v48 = vpop.permute.xlu0 %1745 }
 0xc86   :  { %v1742_v38 = vpop.permute.xlu1 %1741 }
 0xcd0   :  { %v1736_v47 = vpop.f32.mrf.mxu0 }
 0xcd1   :  { %v1751_v49 = vrot.slane %v1736_v47, %v2864_v15 }
 0xcd2   :  { %v2492_v39 = vpop.f32.mrf.mxu0 }
 0xcd3   :  { %v1752_v50 = vadd.f32 %v1751_v49, %v1742_v38  ;;  %v1753_v51 = vadd.f32 %v1751_v49, %v1746_v48 }
 0xcd5   :  { %v1756_v52 = vmul.f32 0.2, %v1752_v50  ;;  %v1757_v53 = vmul.f32 0.2, %v1753_v51  ;;  %vm1755_vm4 = vcmp.gt.f32.partialorder %v1753_v51, 0.0  ;;  %vm1754_vm5 = vcmp.gt.f32.partialorder %v1752_v50, 0.0 }
 0xcd7   :  { %v1759_v54 = vsel %vm1755_vm4, %v1753_v51, %v1757_v53  ;;  %v1758_v55 = vsel %vm1754_vm5, %v1752_v50, %v1756_v52 }
 0xcd8   :  { %v1761_v56 = vadd.f32 %v1759_v54, %v2875_v25  ;;  %v1760_v57 = vadd.f32 %v1758_v55, %v2870_v21 }
 0xcda   :  { %v1765_v58 = vsel %vm62_vm0, %v1761_v56, -inf  ;;  %v1762_v59 = vsel %vm62_vm0, %v1760_v57, -inf }
 0xcdb   :  { %1766 = vmax.xlane.f32.xlu0 %v1765_v58  ;;  %1763 = vmax.xlane.f32.xlu1 %v1762_v59 }
 0xd64   :  { %v1767_v61 = vpop.xlane.xlu0 %1766  ;;  %v1764_v62 = vpop.xlane.xlu1 %1763 }
 0xd65   :  { %v1769_v63 = vsub.f32 %v1761_v56, %v1767_v61  ;;  %v1768_v0 = vsub.f32 %v1760_v57, %v1764_v62 }
 0xd67   :  { %v1772_v1 = vmul.f32 1.442695, %v1769_v63  ;;  %v1770_v2 = vmul.f32 1.442695, %v1768_v0 }
 0xd69   :  { %2599 = vpow2.f32 %v1772_v1 }
 0xd6a   :  { %2601 = vpow2.f32 %v1770_v2 }
 0xd76   :  { %v3101_v21 = vpop.eup %2599 }
 0xd77   :  { %v3103_v25 = vpop.eup %2601  ;;  %v1777_v32 = vsel %vm62_vm0, %v3101_v21, 0.0 }
 0xd78   :  { %2497 = vmatprep.mubr.msk.f32.mxu1 %vm62_vm0, %v3103_v25  ;;  %v1774_v31 = vsel %vm62_vm0, %v3103_v25, 0.0 }
 0xd79   :  { %2498 = vmatmul.mubr.msk.f32.vlgmr.msra.gmra.mxu1 %vm62_vm0, %v3101_v21 }
 0xd7a   :  { %2501 = vmatpush3.msra.mxu1 %v1882_v60  ;;  %2502 = vmatprep.mubr.msk.f32.mxu1 %vm145_vm2, %v1576_v43  ;;  %v2298_v43 = vld [vmem:[%s3205_s10] ss:$0 sm:$0xff] }
 0xd7d   :  { %2503 = vmatmul.mubr.msk.f32.vlgmr.msra.gmra.mxu1 %vm145_vm2, %v1577_v45 }
 0xe39   :  { %v3111_v42 = vpop.f32.mrf.mxu1 }
 0xe3b   :  { %v1860_v8 = vpop.f32.mrf.mxu1 }
 0xe3d   :  { %v2504_v44 = vpop.f32.mrf.mxu1 }
 0xe3e   :  { %2506 = vmatpush3.xpose.msk.msra.mxu0 %vm145_vm2, %v2504_v44  ;;  %2512 = vmatprep.subr.mxu1 %v2504_v44 }
 0xe3f   :  { %v1949_v9 = vpop.f32.mrf.mxu1  ;;  %2513 = vmatpush3.msra.mxu1 %v2504_v44  ;;  %2507 = vmatprep.subr.mxu0 %v2703_v4 }
 0xe40   :  { %2039 = vperm.xlu1 %2549, %v1949_v9   ;;  %2514 = vmatprep.subr.mxu1 %v1949_v9 }
 0xe41   :  { %2515 = vmatpush3.msra.mxu1 %v1949_v9 }
 0xe42   :  { %2508 = vmatpush3.xpose.msk.msra.mxu0 %vm145_vm2, %v1949_v9 }
 0xe44   :  { %2043 = vperm.xlu1 %2549, %v2504_v44  }
 0xe45   :  { %2510 = vmatmul.mubr.msk.f32.vlgmr.msra.gmra.mxu0 %vm145_vm2, %v1958_v12 }
 0xebb   :  { %v2040_v13 = vpop.permute.xlu1 %2039 }
 0xebf   :  { %v2044_v17 = vpop.permute.xlu1 %2043 }
 0xf05   :  { %v2034_v14 = vpop.f32.mrf.mxu0 }
 0xf06   :  { %v2049_v16 = vrot.slane %v2034_v14, %v2864_v15 }
 0xf07   :  { %v2511_v18 = vpop.f32.mrf.mxu0 }
 0xf08   :  { %v2050_v19 = vadd.f32 %v2049_v16, %v2040_v13  ;;  %v2051_v4 = vadd.f32 %v2049_v16, %v2044_v17 }
 0xf0a   :  { %v2054_v20 = vmul.f32 0.2, %v2050_v19  ;;  %v2055_v22 = vmul.f32 0.2, %v2051_v4  ;;  %vm2053_vm1 = vcmp.gt.f32.partialorder %v2051_v4, 0.0  ;;  %vm2052_vm6 = vcmp.gt.f32.partialorder %v2050_v19, 0.0 }
 0xf0c   :  { %v2057_v23 = vsel %vm2053_vm1, %v2051_v4, %v2055_v22  ;;  %v2056_v24 = vsel %vm2052_vm6, %v2050_v19, %v2054_v20 }
 0xf0d   :  { %v2059_v27 = vadd.f32 %v2615_v26, %v2057_v23  ;;  %v2058_v15 = vadd.f32 %v2616_v28, %v2056_v24 }
 0xf0f   :  { %v2063_v29 = vsel %vm62_vm0, %v2059_v27, -inf  ;;  %v2060_v30 = vsel %vm62_vm0, %v2058_v15, -inf }
 0xf10   :  { %2064 = vmax.xlane.f32.xlu0 %v2063_v29  ;;  %2061 = vmax.xlane.f32.xlu1 %v2060_v30 }
 0xf14   :  { %1775 = vadd.xlane.f32.xlu0 %v1774_v31 }
 0xf18   :  { %1778 = vadd.xlane.f32.xlu0 %v1777_v32 }
 0xf99   :  { %v2065_v3 = vpop.xlane.xlu0 %2064  ;;  %v2062_v5 = vpop.xlane.xlu1 %2061 }
 0xf9a   :  { %v2067_v33 = vsub.f32 %v2059_v27, %v2065_v3  ;;  %v2066_v34 = vsub.f32 %v2058_v15, %v2062_v5 }
 0xf9c   :  { %v2070_v35 = vmul.f32 1.442695, %v2067_v33  ;;  %v2068_v36 = vmul.f32 1.442695, %v2066_v34 }
 0xf9d   :  { %v1776_v37 = vpop.xlane.xlu0 %1775 }
 0xf9e   :  { %2603 = vpow2.f32 %v2070_v35 }
 0xf9f   :  { %2605 = vpow2.f32 %v2068_v36 }
 0xfa0   :  { %2607 = vrcp.f32 %v1776_v37 }
 0xfa1   :  { %v1779_v40 = vpop.xlane.xlu0 %1778 }
 0xfa2   :  { %2609 = vrcp.f32 %v1779_v40 }
 0xfab   :  { %v3133_v11 = vpop.eup %2603 }
 0xfac   :  { %v2606_v7 = vpop.eup %2605  ;;  %v2075_v38 = vsel %vm62_vm0, %v3133_v11, 0.0 }
 0xfad   :  { %v2608_v6 = vpop.eup %2607  ;;  %2516 = vmatprep.mubr.msk.f32.mxu1 %vm62_vm0, %v2606_v7  ;;  %v2072_v45 = vsel %vm62_vm0, %v2606_v7, 0.0 }
 0xfae   :  { %v1869_v10 = vmul.f32 %v2608_v6, %v1860_v8  ;;  %2517 = vmatmul.mubr.msk.f32.vlgmr.msra.gmra.mxu1 %vm62_vm0, %v3133_v11  ;;  %2073 = vadd.xlane.f32.xlu0 %v2072_v45  ;;  %v1784_v46 = vmul.f32 %v2608_v6, %v3103_v25 }
 0xfaf   :  { %v2610_v41 = vpop.eup %2609 }
 0xfb0   :  { %v1878_v47 = vadd.f32 %v2298_v43, %v1869_v10  ;;  %v1870_v48 = vmul.f32 %v2610_v41, %v3111_v42  ;;  %v1785_v49 = vmul.f32 %v2610_v41, %v3101_v21  ;;  %1786 = vst.msk [vmem:[#allocation6] sm:$0xff] %vm62_vm0, %v1784_v46 }
 0xfb2   :  { %1880 = vst.msk [vmem:[%s3209_s14] sm:$0xff] %vm145_vm2, %v1878_v47  ;;  %v1879_v39 = vadd.f32 %v2298_v43, %v1870_v48  ;;  %2076 = vadd.xlane.f32.xlu0 %v2075_v38 }
 0xfb3   :  { %1787 = vst.msk [vmem:[#allocation6 + $0x8] sm:$0xff] %vm62_vm0, %v1785_v49 }
 0xfb4   :  { %1881 = vst.msk [vmem:[%s3209_s14 + $0x8] sm:$0xff] %vm145_vm2, %v1879_v39 }
 0xfb5   :  { %2628 = shalt.err (!%p2625_p4)
}
 0xfb6   :  { %s2719_s6 = smov 128   ;;  %s2720_s20 = smov [#allocation2]  }
 0xfb7   :  { %2207 = dma.vmem_to_hbm [thread:$0]  %s2202_s28, 512, %s3212_s17, [#allocation5], %s2719_s6, %s2719_s6, %s2712_s27  }
 0xfb8   :  { %s2189_s14 = sshll.u32 %s2720_s20, 4  ;;  %s2721_s7 = smov [#allocation6]   ;;  %s2190_s14 = int_to_ptr.vmem [resolvable:$true] %s2189_s14 }
 0xfb9   :  { %s2213_s21 = sshll.u32 %s2721_s7, 4  ;;  %s2637_s9 = scalar_lea.vmem %s2190_s14, 1024  ;;  %s2214_s21 = int_to_ptr.vmem [resolvable:$true] %s2213_s21 }
 0xfba   :  { %p2638_p5 = scmp.ne.s32.totalorder %s2190_s14, %s2637_s9  ;;  %p2642_p6 = scmp.lt.s32.totalorder %s2190_s14, %s2190_s14 }
 0xfbb   :  { %p2643_p7 = scmp.lt.s32.totalorder %s2637_s9, %s2637_s9 }
 0xfbd   :  { %p2644_p8 = por %p2643_p7, %p2642_p6 }
 0xfbf   :  { %p2645_p9 = pnand %p2644_p8, %p2638_p5 }
 0xfc1   :  { %2648 = shalt.err (!%p2645_p9)
}
 0xfc2   :  { %2195 = dma.vmem_to_hbm [thread:$0]  %s2190_s14, 1024, %s3211_s16, [#allocation3], %s2719_s6, %s2719_s6, %s2712_s27  }
 0xfc3   :  { %s2657_s17 = scalar_lea.vmem %s2214_s21, 256  ;;  %p2662_p11 = scmp.lt.s32.totalorder %s2214_s21, %s2214_s21 }
 0xfc4   :  { %p2658_p10 = scmp.ne.s32.totalorder %s2214_s21, %s2657_s17  ;;  %p2663_p12 = scmp.lt.s32.totalorder %s2657_s17, %s2657_s17 }
 0xfc6   :  { %p2664_p13 = por %p2663_p12, %p2662_p11 }
 0xfc8   :  { %p2665_p0 = pnand %p2664_p13, %p2658_p10 }
 0xfca   :  { %2668 = shalt.err (!%p2665_p0)
}
 0xfcb   :  { %2219 = dma.vmem_to_hbm [thread:$0]  %s2214_s21, 256, %s3213_s18, [#allocation5], %s2719_s6, %s2719_s6, %s2712_s27  }
 0xfcc   :  { %s2722_s16 = smov [#allocation7]  }
 0xfcd   :  { %s2225_s23 = sshll.u32 %s2722_s16, 4  ;;  %s2226_s23 = int_to_ptr.vmem [resolvable:$true] %s2225_s23 }
 0xfce   :  { %s2677_s12 = scalar_lea.vmem %s2226_s23, 256  ;;  %p2682_p2 = scmp.lt.s32.totalorder %s2226_s23, %s2226_s23 }
 0xfcf   :  { %p2678_p1 = scmp.ne.s32.totalorder %s2226_s23, %s2677_s12  ;;  %p2683_p3 = scmp.lt.s32.totalorder %s2677_s12, %s2677_s12 }
 0xfd1   :  { %p2684_p4 = por %p2683_p3, %p2682_p2 }
 0xfd3   :  { %p2685_p5 = pnand %p2684_p4, %p2678_p1 }
0x1037   :  { %v2074_v50 = vpop.xlane.xlu0 %2073 }
0x1038   :  { %2611 = vrcp.f32 %v2074_v50 }
0x103b   :  { %v2077_v51 = vpop.xlane.xlu0 %2076 }
0x103c   :  { %2613 = vrcp.f32 %v2077_v51 }
0x1045   :  { %v2612_v52 = vpop.eup %2611 }
0x1046   :  { %v2082_v53 = vmul.f32 %v2612_v52, %v2606_v7 }
0x1048   :  { %2084 = vst.msk [vmem:[#allocation7] sm:$0xff] %vm62_vm0, %v2082_v53 }
0x1049   :  { %v2614_v54 = vpop.eup %2613 }
0x104a   :  { %v2083_v55 = vmul.f32 %v2614_v54, %v3133_v11 }
0x104c   :  { %2085 = vst.msk [vmem:[#allocation7 + $0x8] sm:$0xff] %vm62_vm0, %v2083_v55 }
0x104d   :  { %2688 = shalt.err (!%p2685_p5)
}
0x104e   :  { %2231 = dma.vmem_to_hbm [thread:$0]  %s2226_s23, 256, %s3214_s19, [#allocation8], %s2719_s6, %s2719_s6, %s2712_s27  }
0x104f   :  { %v2306_v57 = vld [vmem:[%s3208_s13] ss:$0 sm:$0xff] }
0x106e   :  { %v2518_v56 = vpop.f32.mrf.mxu1 }
0x106f   :  { %v2168_v58 = vmul.f32 %v2614_v54, %v2518_v56 }
0x1070   :  { %v2158_v59 = vpop.f32.mrf.mxu1 }
0x1071   :  { %v2177_v60 = vadd.f32 %v2306_v57, %v2168_v58  ;;  %v2167_v61 = vmul.f32 %v2612_v52, %v2158_v59 }
0x1073   :  { %2179 = vst.msk [vmem:[%s3210_s15 + $0x8] sm:$0xff] %vm145_vm2, %v2177_v60  ;;  %v2176_v62 = vadd.f32 %v2306_v57, %v2167_v61 }
0x1075   :  { %2178 = vst.msk [vmem:[%s3210_s15] sm:$0xff] %vm145_vm2, %v2176_v62 }
0x1076   :  { %2697 = dma.done.wait [#allocation3], 1024  }
0x1077   :  { %2698 = vsyncadd [#allocation3], 4294966272 }
0x1078   :  { %2699 = dma.done.wait [#allocation5], 768  }
0x1079   :  { %2700 = vsyncadd [#allocation5], 4294966528 }
0x107a   :  { %2701 = dma.done.wait [#allocation8], 256  }
0x107b   :  { %2702 = vsyncadd [#allocation8], 4294967040 }
0x107c   :  { %2248 = vsyncpa [#allocation3], 1 }
0x107d   :  { %2249 = vsyncpa [#allocation5], 1 }
0x107e   :  { %2250 = vsyncpa [#allocation8], 1 }

</bundles_post_ra>
